<compile_context>
chip_gen: v6e
topology: v6e:2x2x1
jax: 0.10.0
libtpu: 0.0.40
codegen_flags: <defaults>
</compile_context>

<pallas_src>
import jax
import jax.numpy as jnp
import numpy as np
from jax.experimental import pallas as pl
from jax.experimental.pallas import tpu as pltpu

_BN_EPS = 1e-5


def _mlp_kernel(x_ref, w1_ref, b1_ref, w2_ref, b2_ref, w3_ref, b3_ref, out_ref):
    # x tile: (TB, 32) bf16; weights bf16; biases f32 (1, N) rows.
    x = x_ref[...]

    # Layer 0: Linear(32,64) + Tanh
    h1 = jnp.dot(x, w1_ref[...], preferred_element_type=jnp.float32) + b1_ref[...]
    h1 = jnp.tanh(h1)

    # Layer 1: Linear(64,64) with BatchNorm folded in (eval mode) + Tanh.
    # Dropout(p=0.5) in eval mode is the identity.
    h2 = jnp.dot(h1.astype(jnp.bfloat16), w2_ref[...],
                 preferred_element_type=jnp.float32) + b2_ref[...]
    h2 = jnp.tanh(h2)

    # Output layer: Linear(64,16)
    out = jnp.dot(h2.astype(jnp.bfloat16), w3_ref[...],
                  preferred_element_type=jnp.float32) + b3_ref[...]
    out_ref[...] = out.astype(out_ref.dtype)


def flexible_net_forward(x, w1, b1, w2, b2, gamma, beta, mean, var, w3, b3,
                         *, block_b=512):
    B, d_in = x.shape
    d_out = w3.shape[1]

    # ---- Fold eval-mode BatchNorm into the second Linear (pure affine). ----
    scale = gamma * jax.lax.rsqrt(var + _BN_EPS)          # (1, 64)
    w2_folded = w2 * scale                                 # scale output columns
    b2_folded = (b2 - mean) * scale + beta                 # (1, 64), kept f32

    # ---- bf16 MXU inputs, f32 accumulation. Biases stay f32. ----
    xb = x.astype(jnp.bfloat16)
    w1b = w1.astype(jnp.bfloat16)
    w2b = w2_folded.astype(jnp.bfloat16)
    w3b = w3.astype(jnp.bfloat16)

    tb = min(block_b, B)
    tb = max(8, (tb // 8) * 8)            # keep sublane-aligned batch tiles
    grid = (pl.cdiv(B, tb),)              # rows are independent -> padding-safe

    def const_spec(a):
        # Whole (tiny) array as one block; constant block index across the grid
        # so it is fetched once and stays resident in VMEM.
        return pl.BlockSpec(a.shape, lambda i: (0, 0))

    return pl.pallas_call(
        _mlp_kernel,
        out_shape=jax.ShapeDtypeStruct((B, d_out), jnp.float32),
        grid=grid,
        in_specs=[
            pl.BlockSpec((tb, d_in), lambda i: (i, 0)),    # x: streamed per tile
            const_spec(w1b), const_spec(b1),
            const_spec(w2b), const_spec(b2_folded),
            const_spec(w3b), const_spec(b3),
        ],
        out_specs=pl.BlockSpec((tb, d_out), lambda i: (i, 0)),
        compiler_params=pltpu.CompilerParams(
            dimension_semantics=("parallel",)),            # megacore on v7x
    )(xb, w1b, b1, w2b, b2_folded, w3b, b3)


def _reference_forward(x, w1, b1, w2, b2, gamma, beta, mean, var, w3, b3):
    h1 = jnp.tanh(x @ w1 + b1)
    h2 = h1 @ w2 + b2
    h2 = (h2 - mean) / jnp.sqrt(var + _BN_EPS) * gamma + beta
    h2 = jnp.tanh(h2)
    return h2 @ w3 + b3


if __name__ == "__main__":
    layer_sizes = [32, 64, 64, 16]
    B = 1024  # two batch tiles of 512 -> exercises the pipelined grid

    key = jax.random.PRNGKey(0)
    keys = jax.random.split(key, 4)

    def linear_init(k, fan_in, fan_out):
        # PyTorch nn.Linear default: U(-1/sqrt(fan_in), 1/sqrt(fan_in)).
        # Stored transposed as (in, out) so y = x @ W + b.
        kw, kb = jax.random.split(k)
        bound = float(fan_in) ** -0.5
        w = jax.random.uniform(kw, (fan_in, fan_out), jnp.float32, -bound, bound)
        b = jax.random.uniform(kb, (1, fan_out), jnp.float32, -bound, bound)
        return w, b

    w1, b1 = linear_init(keys[0], layer_sizes[0], layer_sizes[1])
    w2, b2 = linear_init(keys[1], layer_sizes[1], layer_sizes[2])
    w3, b3 = linear_init(keys[2], layer_sizes[2], layer_sizes[3])

    # BatchNorm1d(64) parameters / running stats at init
    gamma = jnp.ones((1, layer_sizes[2]), jnp.float32)
    beta = jnp.zeros((1, layer_sizes[2]), jnp.float32)
    mean = jnp.zeros((1, layer_sizes[2]), jnp.float32)
    var = jnp.ones((1, layer_sizes[2]), jnp.float32)

    x = jax.random.normal(keys[3], (B, layer_sizes[0]), jnp.float32)

    out = flexible_net_forward(x, w1, b1, w2, b2, gamma, beta, mean, var, w3, b3)
    out = jax.block_until_ready(out)

    ref = _reference_forward(x, w1, b1, w2, b2, gamma, beta, mean, var, w3, b3)
    # bf16 matmul inputs with f32 accumulation vs a pure-f32 reference:
    # use bf16-appropriate tolerances.
    np.testing.assert_allclose(np.asarray(out), np.asarray(ref), rtol=2e-2, atol=2e-2)
    assert out.shape == (B, layer_sizes[-1])

    print("KERNEL_OK")
</pallas_src>

<mosaic_0001>
module attributes {stable_mosaic.version = 11 : i64} {
  func.func @_mlp_kernel(%arg0: i32, %arg1: memref<512x32xbf16, #tpu.memory_space<vmem>>, %arg2: memref<32x64xbf16, #tpu.memory_space<vmem>>, %arg3: memref<1x64xf32, #tpu.memory_space<vmem>>, %arg4: memref<64x64xbf16, #tpu.memory_space<vmem>>, %arg5: memref<1x64xf32, #tpu.memory_space<vmem>>, %arg6: memref<64x16xbf16, #tpu.memory_space<vmem>>, %arg7: memref<1x16xf32, #tpu.memory_space<vmem>>, %arg8: memref<512x16xf32, #tpu.memory_space<vmem>>) attributes {dimension_semantics = [#tpu.dimension_semantics<parallel>], iteration_bounds = array<i64: 2>, scalar_prefetch = 0 : i64, scratch_operands = 0 : i64, tpu.core_type = #tpu.core_type<tc>, window_params = [{transform_indices = @transform_0, window_bounds = array<i64: 512, 32>}, {pipeline_mode = #tpu.pipeline_mode<synchronous>, transform_indices = @transform_1, window_bounds = array<i64: 32, 64>}, {pipeline_mode = #tpu.pipeline_mode<synchronous>, transform_indices = @transform_2, window_bounds = array<i64: 1, 64>}, {pipeline_mode = #tpu.pipeline_mode<synchronous>, transform_indices = @transform_3, window_bounds = array<i64: 64, 64>}, {pipeline_mode = #tpu.pipeline_mode<synchronous>, transform_indices = @transform_4, window_bounds = array<i64: 1, 64>}, {pipeline_mode = #tpu.pipeline_mode<synchronous>, transform_indices = @transform_5, window_bounds = array<i64: 64, 16>}, {pipeline_mode = #tpu.pipeline_mode<synchronous>, transform_indices = @transform_6, window_bounds = array<i64: 1, 16>}, {transform_indices = @transform_7, window_bounds = array<i64: 512, 16>}]} {
    %c0 = arith.constant 0 : index
    %c0_0 = arith.constant 0 : index
    %0 = vector.load %arg1[%c0, %c0_0] : memref<512x32xbf16, #tpu.memory_space<vmem>>, vector<512x32xbf16>
    %c0_1 = arith.constant 0 : index
    %c0_2 = arith.constant 0 : index
    %1 = vector.load %arg2[%c0_1, %c0_2] : memref<32x64xbf16, #tpu.memory_space<vmem>>, vector<32x64xbf16>
    %cst = arith.constant dense<0.000000e+00> : vector<512x64xf32>
    %2 = tpu.matmul %0, %1, %cst {dimension_numbers = #tpu.dot_dimension_numbers<[1], [0], [0], [1], [0, 0, 1, 1], [], []>} : vector<512x32xbf16>, vector<32x64xbf16>, vector<512x64xf32> -> vector<512x64xf32>
    %c0_3 = arith.constant 0 : index
    %c0_4 = arith.constant 0 : index
    %3 = vector.load %arg3[%c0_3, %c0_4] : memref<1x64xf32, #tpu.memory_space<vmem>>, vector<1x64xf32>
    %4 = vector.broadcast %3 : vector<1x64xf32> to vector<512x64xf32>
    %5 = arith.addf %2, %4 : vector<512x64xf32>
    %6 = math.tanh %5 : vector<512x64xf32>
    %7 = arith.truncf %6 : vector<512x64xf32> to vector<512x64xbf16>
    %c0_5 = arith.constant 0 : index
    %c0_6 = arith.constant 0 : index
    %8 = vector.load %arg4[%c0_5, %c0_6] : memref<64x64xbf16, #tpu.memory_space<vmem>>, vector<64x64xbf16>
    %cst_7 = arith.constant dense<0.000000e+00> : vector<512x64xf32>
    %9 = tpu.matmul %7, %8, %cst_7 {dimension_numbers = #tpu.dot_dimension_numbers<[1], [0], [0], [1], [0, 0, 1, 1], [], []>} : vector<512x64xbf16>, vector<64x64xbf16>, vector<512x64xf32> -> vector<512x64xf32>
    %c0_8 = arith.constant 0 : index
    %c0_9 = arith.constant 0 : index
    %10 = vector.load %arg5[%c0_8, %c0_9] : memref<1x64xf32, #tpu.memory_space<vmem>>, vector<1x64xf32>
    %11 = vector.broadcast %10 : vector<1x64xf32> to vector<512x64xf32>
    %12 = arith.addf %9, %11 : vector<512x64xf32>
    %13 = math.tanh %12 : vector<512x64xf32>
    %14 = arith.truncf %13 : vector<512x64xf32> to vector<512x64xbf16>
    %c0_10 = arith.constant 0 : index
    %c0_11 = arith.constant 0 : index
    %15 = vector.load %arg6[%c0_10, %c0_11] : memref<64x16xbf16, #tpu.memory_space<vmem>>, vector<64x16xbf16>
    %cst_12 = arith.constant dense<0.000000e+00> : vector<512x16xf32>
    %16 = tpu.matmul %14, %15, %cst_12 {dimension_numbers = #tpu.dot_dimension_numbers<[1], [0], [0], [1], [0, 0, 1, 1], [], []>} : vector<512x64xbf16>, vector<64x16xbf16>, vector<512x16xf32> -> vector<512x16xf32>
    %c0_13 = arith.constant 0 : index
    %c0_14 = arith.constant 0 : index
    %17 = vector.load %arg7[%c0_13, %c0_14] : memref<1x16xf32, #tpu.memory_space<vmem>>, vector<1x16xf32>
    %18 = vector.broadcast %17 : vector<1x16xf32> to vector<512x16xf32>
    %19 = arith.addf %16, %18 : vector<512x16xf32>
    %c0_15 = arith.constant 0 : index
    %c0_16 = arith.constant 0 : index
    %20 = vector.load %arg8[%c0_15, %c0_16] : memref<512x16xf32, #tpu.memory_space<vmem>>, vector<512x16xf32>
    tpu.vector_store %arg8[%c0_15, %c0_16], %19 {strides = array<i32>} : memref<512x16xf32, #tpu.memory_space<vmem>>, vector<512x16xf32>,
    return
  }
  func.func @transform_0(%arg0: i32) -> (i32, i32) {
    %c0_i32 = arith.constant 0 : i32
    %c0_i32_0 = arith.constant 0 : i32
    return %arg0, %c0_i32 : i32, i32
  }
  func.func @transform_1(%arg0: i32) -> (i32, i32) {
    %c0_i32 = arith.constant 0 : i32
    %c0_i32_0 = arith.constant 0 : i32
    %c0_i32_1 = arith.constant 0 : i32
    return %c0_i32, %c0_i32_0 : i32, i32
  }
  func.func @transform_2(%arg0: i32) -> (i32, i32) {
    %c0_i32 = arith.constant 0 : i32
    %c0_i32_0 = arith.constant 0 : i32
    %c0_i32_1 = arith.constant 0 : i32
    return %c0_i32, %c0_i32_0 : i32, i32
  }
  func.func @transform_3(%arg0: i32) -> (i32, i32) {
    %c0_i32 = arith.constant 0 : i32
    %c0_i32_0 = arith.constant 0 : i32
    %c0_i32_1 = arith.constant 0 : i32
    return %c0_i32, %c0_i32_0 : i32, i32
  }
  func.func @transform_4(%arg0: i32) -> (i32, i32) {
    %c0_i32 = arith.constant 0 : i32
    %c0_i32_0 = arith.constant 0 : i32
    %c0_i32_1 = arith.constant 0 : i32
    return %c0_i32, %c0_i32_0 : i32, i32
  }
  func.func @transform_5(%arg0: i32) -> (i32, i32) {
    %c0_i32 = arith.constant 0 : i32
    %c0_i32_0 = arith.constant 0 : i32
    %c0_i32_1 = arith.constant 0 : i32
    return %c0_i32, %c0_i32_0 : i32, i32
  }
  func.func @transform_6(%arg0: i32) -> (i32, i32) {
    %c0_i32 = arith.constant 0 : i32
    %c0_i32_0 = arith.constant 0 : i32
    %c0_i32_1 = arith.constant 0 : i32
    return %c0_i32, %c0_i32_0 : i32, i32
  }
  func.func @transform_7(%arg0: i32) -> (i32, i32) {
    %c0_i32 = arith.constant 0 : i32
    %c0_i32_0 = arith.constant 0 : i32
    return %arg0, %c0_i32 : i32, i32
  }
}

</mosaic_0001>

<bundles_post_ra>
// kernel: tpu_custom_call.1
= control target key start
LH: loop header
LB: loop body
LE: loop exit
PB: predicated region body
PF: predicated region fallthrough
CT: control target
= control target key end

     0   :  { %s2906_s24 = smov 0   ;;  %s3493_s0 = inlined_call_operand.vmem [shape: bf16[1024,32], index: 0, kind: input, shape index: {}]   ;;  %s3494_s1 = inlined_call_operand.vmem [shape: bf16[32,64], index: 1, kind: input, shape index: {}]   ;;  %s3495_s2 = inlined_call_operand.vmem [shape: f32[1,64], index: 2, kind: input, shape index: {}]   ;;  %s3496_s3 = inlined_call_operand.vmem [shape: bf16[64,64], index: 3, kind: input, shape index: {}]   ;;  %s3497_s4 = inlined_call_operand.vmem [shape: f32[1,64], index: 4, kind: input, shape index: {}]   ;;  %s3498_s5 = inlined_call_operand.vmem [shape: bf16[64,16], index: 5, kind: input, shape index: {}]   ;;  %s3499_s6 = inlined_call_operand.vmem [shape: f32[1,16], index: 6, kind: input, shape index: {}]   ;;  %s3500_s7 = inlined_call_operand.vmem [shape: f32[1024,16], index: 7, kind: output, shape index: {}]  }
   0x1 LB: > { %s2078_s25 = sadd.s32 4294967295, %s2864_s24   ;;  %p2082_p0 = scmp.ge.s32.totalorder %s2864_s24, 1  ;;  %s2864_s24 = sphi %s2906_s24, %s17_s24  }
   0x2   : > { %p238_p1 = scmp.lt.s32.totalorder %s2864_s24, 3 }
   0x4   : > { %p239_p2 = pnand %p2082_p0, %p238_p1 }
   0x5   : > { %s2083_s28 = sshll.u32 (!%p239_p2), %s2078_s25, 6 }
   0x6   : > { %242 = sbr.rel (%p239_p2) target bundleno = 778 (0x30a), region = 48  ;;  %p271_p3 = scmp.lt.s32.totalorder (!%p239_p2), %s2083_s28, 127 }
   0xb   : > { %v2560_v0 = vld [vmem:[%s3494_s1 + $0x8] sm:$0xff]   ;;  %v2561_v1 = vld [vmem:[%s3494_s1] sm:$0xff]   ;;  %s3502_s28 = smov (!%p271_p3, %s2083_s28), 127  ;;  %v2594_v2 = vld [vmem:[%s3496_s3 + $0x18] sm:$0xff]   ;;  %vm530_vm0 = vcmask 261120   ;;  %vm1051_vm1 = vcmask 523264  }
   0xc   : > { %2336 = vmatprep.subr.bf16.mxu0 %v2560_v0  ;;  %2548 = vmatprep.subr.bf16.mxu1 %v2560_v0  ;;  %s2084_s10 = sshll.u32 %s3502_s28, 2  ;;  %v2595_v11 = vld [vmem:[%s3496_s3 + $0x10] sm:$0xff]   ;;  %v2596_v14 = vld [vmem:[%s3496_s3 + $0x8] sm:$0xff]   ;;  %v2597_v37 = vld [vmem:[%s3496_s3] sm:$0xff]   ;;  %s2086_s11 = sshll.u32 %s3502_s28, 3  ;;  %vm1957_vm2 = vcmask 130048  }
   0xd   : > { %2337 = vmatpush3.bf16.msra.mxu0 %v2560_v0  ;;  %2550 = vmatpush3.bf16.msra.mxu1 %v2560_v0  ;;  %s2929_s13 = scalar_lea.vmem %s3493_s0, %s2084_s10  ;;  %v3007_v39 = vld [vmem:[%s3495_s2] ss:$0 sm:$0xff]  ;;  %v2598_v59 = vld [vmem:[%s3498_s5 + $0x18] sm:$0xff]   ;;  %v2599_v60 = vld [vmem:[%s3498_s5 + $0x10] sm:$0xff]   ;;  %s3296_s16 = scalar_lea.vmem %s3500_s7, %s2086_s11 }
   0xe   : > { %2338 = vmatprep.subr.bf16.mxu0 %v2561_v1  ;;  %2549 = vmatprep.subr.bf16.mxu1 %v2561_v1  ;;  %v2562_v3 = vld [vmem:[%s2929_s13] sm:$0xff]   ;;  %v2563_v4 = vld [vmem:[%s2929_s13 + $0x8] sm:$0xff]   ;;  %v2564_v5 = vld [vmem:[%s2929_s13 + $0x10] sm:$0xff]  }
   0xf   : > { %2340 = vmatprep.mubr.msk.bf16.mxu0 %vm530_vm0, %v2562_v3  ;;  %v2565_v6 = vld [vmem:[%s2929_s13 + $0x18] sm:$0xff]   ;;  %v2566_v7 = vld [vmem:[%s2929_s13 + $0x20] sm:$0xff]   ;;  %v2567_v8 = vld [vmem:[%s2929_s13 + $0x28] sm:$0xff]  }
  0x10   : > { %v2568_v9 = vld [vmem:[%s2929_s13 + $0x30] sm:$0xff]   ;;  %v2578_v10 = vld [vmem:[%s2929_s13 + $0x80] sm:$0xff]   ;;  %v2579_v12 = vld [vmem:[%s2929_s13 + $0x88] sm:$0xff]  }
  0x11   : > { %2339 = vmatpush3.bf16.msra.mxu0 %v2561_v1  ;;  %2551 = vmatpush3.bf16.msra.mxu1 %v2561_v1  ;;  %v2580_v13 = vld [vmem:[%s2929_s13 + $0x90] sm:$0xff]   ;;  %v2569_v15 = vld [vmem:[%s2929_s13 + $0x38] sm:$0xff]   ;;  %v2570_v16 = vld [vmem:[%s2929_s13 + $0x40] sm:$0xff]  }
  0x12   : > { %2404 = vmatprep.subr.bf16.mxu1 %v2594_v2  ;;  %2372 = vmatprep.mubr.msk.bf16.mxu1 %vm530_vm0, %v2578_v10  ;;  %v2581_v17 = vld [vmem:[%s2929_s13 + $0x98] sm:$0xff]   ;;  %v2582_v18 = vld [vmem:[%s2929_s13 + $0xa0] sm:$0xff]   ;;  %v2571_v19 = vld [vmem:[%s2929_s13 + $0x48] sm:$0xff]  }
  0x13   : > { %v2572_v20 = vld [vmem:[%s2929_s13 + $0x50] sm:$0xff]   ;;  %v2583_v21 = vld [vmem:[%s2929_s13 + $0xa8] sm:$0xff]   ;;  %v2573_v23 = vld [vmem:[%s2929_s13 + $0x58] sm:$0xff]   ;;  %2476 = vmatprep.subr.bf16.mxu0 %v2598_v59 }
  0x14   : > { %2341 = vmatmul.mubr.msk.bf16.vlgmr.msra.gmra.mxu0 %vm530_vm0, %v2563_v4  ;;  %2373 = vmatmul.mubr.msk.bf16.vlgmr.msra.gmra.mxu1 %vm530_vm0, %v2579_v12  ;;  %v2584_v22 = vld [vmem:[%s2929_s13 + $0xb0] sm:$0xff]   ;;  %v2585_v24 = vld [vmem:[%s2929_s13 + $0xb8] sm:$0xff]   ;;  %v2574_v25 = vld [vmem:[%s2929_s13 + $0x60] sm:$0xff]  }
  0x15   : > { %2344 = vmatprep.mubr.msk.bf16.mxu0 %vm530_vm0, %v2564_v5  ;;  %2376 = vmatprep.mubr.msk.bf16.mxu1 %vm530_vm0, %v2580_v13  ;;  %v2586_v26 = vld [vmem:[%s2929_s13 + $0xc0] sm:$0xff]   ;;  %v2575_v27 = vld [vmem:[%s2929_s13 + $0x68] sm:$0xff]   ;;  %v2576_v29 = vld [vmem:[%s2929_s13 + $0x70] sm:$0xff]  }
  0x16   : > { %2405 = vmatpush3.bf16.msra.mxu1 %v2594_v2  ;;  %v2587_v28 = vld [vmem:[%s2929_s13 + $0xc8] sm:$0xff]   ;;  %v2588_v30 = vld [vmem:[%s2929_s13 + $0xd0] sm:$0xff]   ;;  %v2577_v31 = vld [vmem:[%s2929_s13 + $0x78] sm:$0xff]   ;;  %2477 = vmatpush3.bf16.msra.mxu0 %v2598_v59 }
  0x17   : > { %2406 = vmatprep.subr.bf16.mxu1 %v2595_v11  ;;  %v2589_v32 = vld [vmem:[%s2929_s13 + $0xd8] sm:$0xff]   ;;  %v2590_v33 = vld [vmem:[%s2929_s13 + $0xe0] sm:$0xff]   ;;  %v2591_v34 = vld [vmem:[%s2929_s13 + $0xe8] sm:$0xff]   ;;  %2478 = vmatprep.subr.bf16.mxu0 %v2599_v60 }
  0x18   : > { %v2592_v35 = vld [vmem:[%s2929_s13 + $0xf0] sm:$0xff]   ;;  %v2593_v36 = vld [vmem:[%s2929_s13 + $0xf8] sm:$0xff]  }
  0x1a   : > { %2407 = vmatpush3.bf16.msra.mxu1 %v2595_v11  ;;  %2479 = vmatpush3.bf16.msra.mxu0 %v2599_v60 }
  0x1b   : > { %2408 = vmatprep.subr.bf16.mxu1 %v2596_v14 }
  0x1c   : > { %2345 = vmatmul.mubr.msk.bf16.gmra.mxu0 %vm530_vm0, %v2565_v6  ;;  %2377 = vmatmul.mubr.msk.bf16.gmra.mxu1 %vm530_vm0, %v2581_v17 }
  0x1d   : > { %2348 = vmatprep.mubr.msk.bf16.mxu0 %vm530_vm0, %v2566_v7  ;;  %2380 = vmatprep.mubr.msk.bf16.mxu1 %vm530_vm0, %v2582_v18  ;;  %v2600_v7 = vld [vmem:[%s3498_s5 + $0x8] sm:$0xff]  }
  0x1e   : > { %2409 = vmatpush3.bf16.msra.mxu1 %v2596_v14  ;;  %2480 = vmatprep.subr.bf16.mxu0 %v2600_v7 }
  0x1f   : > { %2410 = vmatprep.subr.bf16.mxu1 %v2597_v37  ;;  %2481 = vmatpush3.bf16.msra.mxu0 %v2600_v7 }
  0x22   : > { %2411 = vmatpush3.bf16.msra.mxu1 %v2597_v37 }
  0x24   : > { %2349 = vmatmul.mubr.msk.bf16.gmra.mxu0 %vm530_vm0, %v2567_v8  ;;  %2381 = vmatmul.mubr.msk.bf16.gmra.mxu1 %vm530_vm0, %v2583_v21 }
  0x25   : > { %2352 = vmatprep.mubr.msk.bf16.mxu0 %vm530_vm0, %v2568_v9  ;;  %2384 = vmatprep.mubr.msk.bf16.mxu1 %vm530_vm0, %v2584_v22 }
  0x2c   : > { %2353 = vmatmul.mubr.msk.bf16.gmra.mxu0 %vm530_vm0, %v2569_v15  ;;  %2385 = vmatmul.mubr.msk.bf16.gmra.mxu1 %vm530_vm0, %v2585_v24 }
  0x2d   : > { %2356 = vmatprep.mubr.msk.bf16.mxu0 %vm530_vm0, %v2570_v16  ;;  %2388 = vmatprep.mubr.msk.bf16.mxu1 %vm530_vm0, %v2586_v26 }
  0x34   : > { %2357 = vmatmul.mubr.msk.bf16.gmra.mxu0 %vm530_vm0, %v2571_v19  ;;  %2389 = vmatmul.mubr.msk.bf16.gmra.mxu1 %vm530_vm0, %v2587_v28 }
  0x35   : > { %2360 = vmatprep.mubr.msk.bf16.mxu0 %vm530_vm0, %v2572_v20  ;;  %2392 = vmatprep.mubr.msk.bf16.mxu1 %vm530_vm0, %v2588_v30 }
  0x3c   : > { %2361 = vmatmul.mubr.msk.bf16.gmra.mxu0 %vm530_vm0, %v2573_v23  ;;  %2393 = vmatmul.mubr.msk.bf16.gmra.mxu1 %vm530_vm0, %v2589_v32 }
  0x3d   : > { %2364 = vmatprep.mubr.msk.bf16.mxu0 %vm530_vm0, %v2574_v25  ;;  %2396 = vmatprep.mubr.msk.bf16.mxu1 %vm530_vm0, %v2590_v33 }
  0x44   : > { %2365 = vmatmul.mubr.msk.bf16.gmra.mxu0 %vm530_vm0, %v2575_v27  ;;  %2397 = vmatmul.mubr.msk.bf16.gmra.mxu1 %vm530_vm0, %v2591_v34 }
  0x45   : > { %2368 = vmatprep.mubr.msk.bf16.mxu0 %vm530_vm0, %v2576_v29  ;;  %2400 = vmatprep.mubr.msk.bf16.mxu1 %vm530_vm0, %v2592_v35 }
  0x4c   : > { %2369 = vmatmul.mubr.msk.bf16.gmra.mxu0 %vm530_vm0, %v2577_v31  ;;  %2401 = vmatmul.mubr.msk.bf16.gmra.mxu1 %vm530_vm0, %v2593_v36 }
  0xd4   : > { %v2342_v38 = vpop.f32.mrf.mxu0  ;;  %v3017_v56 = vpop.f32.mrf.mxu1 }
  0xd5   : > { %v670_v44 = vadd.f32 %v2342_v38, %v3007_v39 }
  0xd6   : > { %v661_v40 = vpop.f32.mrf.mxu0  ;;  %v3019_v58 = vpop.f32.mrf.mxu1 }
  0xd7   : > { %v662_v41 = vadd.f32 %v3007_v39, %v661_v40 }
  0xd8   : > { %v2343_v42 = vpop.f32.mrf.mxu0  ;;  %v3028_v0 = vpop.f32.mrf.mxu1 }
  0xd9   : > { %v673_v43 = vadd.f32 %v2343_v42, %v3007_v39  ;;  %2602 = vtanh.f32 %v662_v41 }
  0xda   : > { %v664_v45 = vpop.f32.mrf.mxu0  ;;  %v3032_v6 = vpop.f32.mrf.mxu1 }
  0xdb   : > { %v665_v46 = vadd.f32 %v3007_v39, %v664_v45  ;;  %2604 = vtanh.f32 %v673_v43 }
  0xdc   : > { %v2346_v47 = vpop.f32.mrf.mxu0  ;;  %v3038_v13 = vpop.f32.mrf.mxu1 }
  0xdd   : > { %2606 = vtanh.f32 %v665_v46  ;;  %v686_v52 = vadd.f32 %v2346_v47, %v3007_v39 }
  0xde   : > { %2608 = vtanh.f32 %v670_v44  ;;  %v677_v48 = vpop.f32.mrf.mxu0  ;;  %v3042_v15 = vpop.f32.mrf.mxu1 }
  0xdf   : > { %v678_v49 = vadd.f32 %v3007_v39, %v677_v48 }
  0xe0   : > { %v2347_v50 = vpop.f32.mrf.mxu0  ;;  %v3045_v19 = vpop.f32.mrf.mxu1 }
  0xe1   : > { %v689_v51 = vadd.f32 %v2347_v50, %v3007_v39  ;;  %2610 = vtanh.f32 %v678_v49 }
  0xe2   : > { %v680_v53 = vpop.f32.mrf.mxu0  ;;  %v3049_v25 = vpop.f32.mrf.mxu1 }
  0xe3   : > { %v681_v54 = vadd.f32 %v3007_v39, %v680_v53  ;;  %2612 = vtanh.f32 %v689_v51 }
  0xe4   : > { %v2350_v55 = vpop.f32.mrf.mxu0  ;;  %v3052_v31 = vpop.f32.mrf.mxu1 }
  0xe5   : > { %2614 = vtanh.f32 %v681_v54  ;;  %v702_v4 = vadd.f32 %v2350_v55, %v3007_v39 }
  0xe6   : > { %2616 = vtanh.f32 %v686_v52  ;;  %v693_v57 = vpop.f32.mrf.mxu0  ;;  %v2603_v62 = vpop.eup %2602 }
  0xe7   : > { %v694_v61 = vadd.f32 %v3007_v39, %v693_v57  ;;  %v3056_v33 = vpop.f32.mrf.mxu1 }
  0xe8   : > { %v2351_v63 = vpop.f32.mrf.mxu0  ;;  %v2605_v1 = vpop.eup %2604 }
  0xe9   : > { %v705_v2 = vadd.f32 %v2351_v63, %v3007_v39  ;;  %2618 = vtanh.f32 %v694_v61  ;;  %v3059_v37 = vpop.f32.mrf.mxu1 }
  0xea   : > { %v2607_v3 = vpop.eup %2606  ;;  %v696_v5 = vpop.f32.mrf.mxu0 }
  0xeb   : > { %v2609_v8 = vpop.eup %2608  ;;  %v697_v9 = vadd.f32 %v3007_v39, %v696_v5  ;;  %v980_v10 = vpack.c.bf16 %v2607_v3, %v2603_v62  ;;  %2620 = vtanh.f32 %v705_v2  ;;  %v3063_v44 = vpop.f32.mrf.mxu1 }
  0xec   : > { %v981_v11 = vpack.c.bf16 %v2605_v1, %v2609_v8  ;;  %v2354_v12 = vpop.f32.mrf.mxu0 }
  0xed   : > { %2622 = vtanh.f32 %v697_v9  ;;  %2412 = vmatprep.mubr.msk.bf16.mxu1 %vm1051_vm1, %v980_v10  ;;  %v718_v23 = vadd.f32 %v2354_v12, %v3007_v39  ;;  %v3066_v50 = vpop.f32.mrf.mxu1 }
  0xee   : > { %2624 = vtanh.f32 %v702_v4  ;;  %v709_v14 = vpop.f32.mrf.mxu0  ;;  %2413 = vmatmul.mubr.msk.bf16.vlgmr.msra.gmra.mxu1 %vm1051_vm1, %v981_v11  ;;  %v2611_v17 = vpop.eup %2610 }
  0xef   : > { %v710_v16 = vadd.f32 %v3007_v39, %v709_v14  ;;  %v3070_v52 = vpop.f32.mrf.mxu1 }
  0xf0   : > { %v2355_v18 = vpop.f32.mrf.mxu0  ;;  %v2613_v20 = vpop.eup %2612 }
  0xf1   : > { %v721_v21 = vadd.f32 %v2355_v18, %v3007_v39  ;;  %2626 = vtanh.f32 %v710_v16  ;;  %v3073_v57 = vpop.f32.mrf.mxu1 }
  0xf2   : > { %v2615_v22 = vpop.eup %2614  ;;  %v712_v24 = vpop.f32.mrf.mxu0 }
  0xf3   : > { %v2617_v26 = vpop.eup %2616  ;;  %v713_v27 = vadd.f32 %v3007_v39, %v712_v24  ;;  %v982_v28 = vpack.c.bf16 %v2615_v22, %v2611_v17  ;;  %2628 = vtanh.f32 %v721_v21  ;;  %v3078_v7 = vpop.f32.mrf.mxu1 }
  0xf4   : > { %v2358_v29 = vpop.f32.mrf.mxu0  ;;  %v983_v30 = vpack.c.bf16 %v2613_v20, %v2617_v26 }
  0xf5   : > { %2630 = vtanh.f32 %v713_v27  ;;  %2416 = vmatprep.mubr.msk.bf16.mxu1 %vm1051_vm1, %v982_v28  ;;  %v734_v42 = vadd.f32 %v2358_v29, %v3007_v39  ;;  %v3083_v12 = vpop.f32.mrf.mxu1  ;;  %v790_v28 = vadd.f32 %v3007_v39, %v3019_v58 }
  0xf6   : > { %2632 = vtanh.f32 %v718_v23  ;;  %v725_v32 = vpop.f32.mrf.mxu0  ;;  %2417 = vmatmul.mubr.msk.bf16.gmra.mxu1 %vm1051_vm1, %v983_v30  ;;  %v2619_v35 = vpop.eup %2618  ;;  %v793_v30 = vadd.f32 %v3007_v39, %v3032_v6 }
  0xf7   : > { %v726_v34 = vadd.f32 %v3007_v39, %v725_v32  ;;  %v3088_v27 = vpop.f32.mrf.mxu1 }
  0xf8   : > { %v2359_v36 = vpop.f32.mrf.mxu0  ;;  %v2621_v38 = vpop.eup %2620 }
  0xf9   : > { %v737_v40 = vadd.f32 %v2359_v36, %v3007_v39  ;;  %2634 = vtanh.f32 %v726_v34  ;;  %v3097_v36 = vpop.f32.mrf.mxu1 }
  0xfa   : > { %v2623_v41 = vpop.eup %2622  ;;  %v728_v43 = vpop.f32.mrf.mxu0 }
  0xfb   : > { %v2625_v45 = vpop.eup %2624  ;;  %v729_v46 = vadd.f32 %v3007_v39, %v728_v43  ;;  %v984_v47 = vpack.c.bf16 %v2623_v41, %v2619_v35  ;;  %2636 = vtanh.f32 %v737_v40 }
  0xfc   : > { %v2362_v48 = vpop.f32.mrf.mxu0  ;;  %v985_v49 = vpack.c.bf16 %v2621_v38, %v2625_v45 }
  0xfd   : > { %2638 = vtanh.f32 %v729_v46  ;;  %2420 = vmatprep.mubr.msk.bf16.mxu1 %vm1051_vm1, %v984_v47  ;;  %v750_v62 = vadd.f32 %v2362_v48, %v3007_v39  ;;  %v3102_v47 = vpop.f32.mrf.mxu1  ;;  %v798_v48 = vadd.f32 %v3017_v56, %v3007_v39 }
  0xfe   : > { %2640 = vtanh.f32 %v734_v42  ;;  %v741_v51 = vpop.f32.mrf.mxu0  ;;  %2421 = vmatmul.mubr.msk.bf16.gmra.mxu1 %vm1051_vm1, %v985_v49  ;;  %v2627_v54 = vpop.eup %2626  ;;  %v806_v49 = vadd.f32 %v3007_v39, %v3042_v15  ;;  %v814_v15 = vadd.f32 %v3038_v13, %v3007_v39 }
  0xff   : > { %v742_v53 = vadd.f32 %v3007_v39, %v741_v51  ;;  %v809_v51 = vadd.f32 %v3007_v39, %v3049_v25 }
 0x100   : > { %v2363_v55 = vpop.f32.mrf.mxu0  ;;  %v2629_v59 = vpop.eup %2628 }
 0x101   : > { %v753_v60 = vadd.f32 %v2363_v55, %v3007_v39  ;;  %2642 = vtanh.f32 %v742_v53  ;;  %v3114_v55 = vpop.f32.mrf.mxu1 }
 0x102   : > { %v2631_v61 = vpop.eup %2630  ;;  %v744_v63 = vpop.f32.mrf.mxu0 }
 0x103   : > { %v2633_v1 = vpop.eup %2632  ;;  %v745_v2 = vadd.f32 %v3007_v39, %v744_v63  ;;  %v986_v3 = vpack.c.bf16 %v2631_v61, %v2627_v54  ;;  %2644 = vtanh.f32 %v753_v60  ;;  %v801_v54 = vadd.f32 %v3028_v0, %v3007_v39  ;;  %v869_v63 = vpop.f32.mrf.mxu1 }
 0x104   : > { %v2366_v4 = vpop.f32.mrf.mxu0  ;;  %v987_v5 = vpack.c.bf16 %v2629_v59, %v2633_v1  ;;  %v822_v0 = vadd.f32 %v3007_v39, %v3056_v33 }
 0x105   : > { %2646 = vtanh.f32 %v745_v2  ;;  %2424 = vmatprep.mubr.msk.bf16.mxu1 %vm1051_vm1, %v986_v3  ;;  %v766_v18 = vadd.f32 %v2366_v4, %v3007_v39  ;;  %v825_v2 = vadd.f32 %v3007_v39, %v3063_v44  ;;  %v817_v4 = vadd.f32 %v3045_v19, %v3007_v39 }
 0x106   : > { %2648 = vtanh.f32 %v750_v62  ;;  %v757_v8 = vpop.f32.mrf.mxu0  ;;  %2425 = vmatmul.mubr.msk.bf16.gmra.mxu1 %vm1051_vm1, %v987_v5  ;;  %v2635_v10 = vpop.eup %2634  ;;  %v830_v44 = vadd.f32 %v3052_v31, %v3007_v39  ;;  %v838_v19 = vadd.f32 %v3007_v39, %v3070_v52 }
 0x107   : > { %v758_v9 = vadd.f32 %v3007_v39, %v757_v8  ;;  %v3126_v5 = vpop.f32.mrf.mxu1 }
 0x108   : > { %v2367_v11 = vpop.f32.mrf.mxu0  ;;  %v2637_v14 = vpop.eup %2636 }
 0x109   : > { %v769_v16 = vadd.f32 %v2367_v11, %v3007_v39  ;;  %2650 = vtanh.f32 %v758_v9 }
 0x10a   : > { %v2639_v17 = vpop.eup %2638  ;;  %v760_v20 = vpop.f32.mrf.mxu0 }
 0x10b   : > { %v2641_v21 = vpop.eup %2640  ;;  %v761_v22 = vadd.f32 %v3007_v39, %v760_v20  ;;  %v988_v23 = vpack.c.bf16 %v2639_v17, %v2635_v10  ;;  %2652 = vtanh.f32 %v769_v16 }
 0x10c   : > { %v2370_v24 = vpop.f32.mrf.mxu0  ;;  %v989_v26 = vpack.c.bf16 %v2637_v14, %v2641_v21  ;;  %v872_v14 = vpop.f32.mrf.mxu1  ;;  %v833_v21 = vadd.f32 %v3059_v37, %v3007_v39 }
 0x10d   : > { %2654 = vtanh.f32 %v761_v22  ;;  %2428 = vmatprep.mubr.msk.bf16.mxu1 %vm1051_vm1, %v988_v23  ;;  %v782_v58 = vadd.f32 %v2370_v24, %v3007_v39 }
 0x10e   : > { %2656 = vtanh.f32 %v766_v18  ;;  %v773_v29 = vpop.f32.mrf.mxu0  ;;  %2429 = vmatmul.mubr.msk.bf16.gmra.mxu1 %vm1051_vm1, %v989_v26  ;;  %v2643_v34 = vpop.eup %2642  ;;  %v841_v18 = vadd.f32 %v3007_v39, %v3078_v7  ;;  %v846_v26 = vadd.f32 %v3066_v50, %v3007_v39  ;;  %v854_v7 = vadd.f32 %v3007_v39, %v3088_v27 }
 0x10f   : > { %v774_v32 = vadd.f32 %v3007_v39, %v773_v29  ;;  %2658 = vtanh.f32 %v790_v28  ;;  %v3139_v22 = vpop.f32.mrf.mxu1  ;;  %v857_v29 = vadd.f32 %v3007_v39, %v3102_v47  ;;  %v862_v27 = vadd.f32 %v3083_v12, %v3007_v39 }
 0x110   : > { %v2371_v35 = vpop.f32.mrf.mxu0  ;;  %v2645_v38 = vpop.eup %2644  ;;  %2660 = vtanh.f32 %v793_v30 }
 0x111   : > { %v785_v40 = vadd.f32 %v2371_v35, %v3007_v39  ;;  %2662 = vtanh.f32 %v774_v32  ;;  %v885_v52 = vpop.f32.mrf.mxu1  ;;  %v849_v32 = vadd.f32 %v3073_v57, %v3007_v39  ;;  %v873_v57 = vadd.f32 %v3007_v39, %v872_v14 }
 0x112   : > { %v2647_v41 = vpop.eup %2646  ;;  %v776_v42 = vpop.f32.mrf.mxu0 }
 0x113   : > { %v2649_v43 = vpop.eup %2648  ;;  %v777_v45 = vadd.f32 %v3007_v39, %v776_v42  ;;  %v990_v6 = vpack.c.bf16 %v2647_v41, %v2643_v34  ;;  %2664 = vtanh.f32 %v785_v40  ;;  %v2399_v34 = vpop.f32.mrf.mxu1 }
 0x114   : > { %v991_v46 = vpack.c.bf16 %v2645_v38, %v2649_v43 }
 0x115   : > { %2666 = vtanh.f32 %v777_v45  ;;  %2432 = vmatprep.mubr.msk.bf16.mxu1 %vm1051_vm1, %v990_v6  ;;  %v888_v40 = vpop.f32.mrf.mxu1  ;;  %v865_v45 = vadd.f32 %v3097_v36, %v3007_v39 }
 0x116   : > { %2668 = vtanh.f32 %v782_v58  ;;  %2433 = vmatmul.mubr.msk.bf16.gmra.mxu1 %vm1051_vm1, %v991_v46  ;;  %v2651_v53 = vpop.eup %2650  ;;  %v870_v58 = vadd.f32 %v3007_v39, %v869_v63  ;;  %v889_v36 = vadd.f32 %v3007_v39, %v888_v40 }
 0x117   : > { %2670 = vtanh.f32 %v798_v48  ;;  %v2402_v6 = vpop.f32.mrf.mxu1 }
 0x118   : > { %v2653_v59 = vpop.eup %2652  ;;  %2672 = vtanh.f32 %v806_v49  ;;  %v878_v49 = vadd.f32 %v3114_v55, %v3007_v39  ;;  %v2601_v55 = vld [vmem:[%s3498_s5] sm:$0xff]  }
 0x119   : > { %2674 = vtanh.f32 %v809_v51  ;;  %v901_v48 = vpop.f32.mrf.mxu1  ;;  %2482 = vmatprep.subr.bf16.mxu0 %v2601_v55 }
 0x11a   : > { %v2655_v56 = vpop.eup %2654  ;;  %2676 = vtanh.f32 %v801_v54  ;;  %2483 = vmatpush3.bf16.msra.mxu0 %v2601_v55 }
 0x11b   : > { %v2657_v60 = vpop.eup %2656  ;;  %v992_v61 = vpack.c.bf16 %v2655_v56, %v2651_v53  ;;  %2678 = vtanh.f32 %v814_v15  ;;  %v886_v53 = vadd.f32 %v3007_v39, %v885_v52  ;;  %v881_v56 = vadd.f32 %v3126_v5, %v3007_v39 }
 0x11c   : > { %v993_v62 = vpack.c.bf16 %v2653_v59, %v2657_v60  ;;  %v2659_v25 = vpop.eup %2658  ;;  %2680 = vtanh.f32 %v822_v0  ;;  %v2403_v60 = vpop.f32.mrf.mxu1  ;;  %v897_v5 = vadd.f32 %v2399_v34, %v3007_v39 }
 0x11d   : > { %2436 = vmatprep.mubr.msk.bf16.mxu1 %vm1051_vm1, %v992_v61  ;;  %v2661_v1 = vpop.eup %2660  ;;  %2682 = vtanh.f32 %v825_v2 }
 0x11e   : > { %2437 = vmatmul.mubr.msk.bf16.gmra.mxu1 %vm1051_vm1, %v993_v62  ;;  %v2663_v3 = vpop.eup %2662  ;;  %v996_v11 = vpack.c.bf16 %v2661_v1, %v2659_v25  ;;  %2684 = vtanh.f32 %v817_v4  ;;  %v904_v15 = vpop.f32.mrf.mxu1  ;;  %v894_v25 = vadd.f32 %v3139_v22, %v3007_v39  ;;  %v902_v1 = vadd.f32 %v3007_v39, %v901_v48 }
 0x11f   : > { %2686 = vtanh.f32 %v830_v44  ;;  %v913_v44 = vadd.f32 %v2403_v60, %v3007_v39 }
 0x120   : > { %v2665_v8 = vpop.eup %2664  ;;  %2688 = vtanh.f32 %v838_v19 }
 0x121   : > { %2690 = vtanh.f32 %v841_v18 }
 0x122   : > { %v2667_v13 = vpop.eup %2666  ;;  %2692 = vtanh.f32 %v833_v21 }
 0x123   : > { %v2669_v9 = vpop.eup %2668  ;;  %v994_v10 = vpack.c.bf16 %v2667_v13, %v2663_v3  ;;  %2694 = vtanh.f32 %v846_v26  ;;  %v905_v3 = vadd.f32 %v3007_v39, %v904_v15 }
 0x124   : > { %v995_v33 = vpack.c.bf16 %v2665_v8, %v2669_v9  ;;  %v2671_v16 = vpop.eup %2670  ;;  %2696 = vtanh.f32 %v854_v7 }
 0x125   : > { %2440 = vmatprep.mubr.msk.bf16.mxu1 %vm1051_vm1, %v994_v10  ;;  %v2673_v17 = vpop.eup %2672  ;;  %2698 = vtanh.f32 %v857_v29 }
 0x126   : > { %2441 = vmatmul.mubr.msk.bf16.gmra.mxu1 %vm1051_vm1, %v995_v33  ;;  %v2675_v20 = vpop.eup %2674  ;;  %2700 = vtanh.f32 %v849_v32  ;;  %v910_v33 = vadd.f32 %v2402_v6, %v3007_v39 }
 0x127   : > { %2444 = vmatprep.mubr.msk.bf16.mxu1 %vm1051_vm1, %v996_v11  ;;  %v2677_v31 = vpop.eup %2676  ;;  %v998_v23 = vpack.c.bf16 %v2675_v20, %v2673_v17  ;;  %2702 = vtanh.f32 %v862_v27 }
 0x128   : > { %v997_v24 = vpack.c.bf16 %v2677_v31, %v2671_v16  ;;  %v2679_v28 = vpop.eup %2678  ;;  %2704 = vtanh.f32 %v870_v58 }
 0x129   : > { %v2681_v37 = vpop.eup %2680  ;;  %2706 = vtanh.f32 %v873_v57 }
 0x12a   : > { %v2683_v30 = vpop.eup %2682  ;;  %2708 = vtanh.f32 %v865_v45 }
 0x12b   : > { %v2685_v35 = vpop.eup %2684  ;;  %v1000_v50 = vpack.c.bf16 %v2683_v30, %v2681_v37  ;;  %2710 = vtanh.f32 %v878_v49 }
 0x12c   : > { %v999_v38 = vpack.c.bf16 %v2685_v35, %v2679_v28  ;;  %v2687_v41 = vpop.eup %2686  ;;  %2712 = vtanh.f32 %v886_v53  ;;  %v3189_v28 = vld [vmem:[%s3497_s4] ss:$0 sm:$0xff] }
 0x12d   : > { %v2689_v42 = vpop.eup %2688  ;;  %2714 = vtanh.f32 %v889_v36 }
 0x12e   : > { %2445 = vmatmul.mubr.msk.bf16.gmra.mxu1 %vm1051_vm1, %v997_v24  ;;  %v2691_v43 = vpop.eup %2690  ;;  %2716 = vtanh.f32 %v881_v56 }
 0x12f   : > { %2448 = vmatprep.mubr.msk.bf16.mxu1 %vm1051_vm1, %v998_v23  ;;  %v2693_v46 = vpop.eup %2692  ;;  %v1002_v12 = vpack.c.bf16 %v2691_v43, %v2689_v42  ;;  %2718 = vtanh.f32 %v894_v25 }
 0x130   : > { %v1001_v47 = vpack.c.bf16 %v2693_v46, %v2687_v41  ;;  %v2695_v51 = vpop.eup %2694  ;;  %2720 = vtanh.f32 %v902_v1 }
 0x131   : > { %v2697_v54 = vpop.eup %2696  ;;  %2722 = vtanh.f32 %v905_v3 }
 0x132   : > { %v2699_v59 = vpop.eup %2698  ;;  %2724 = vtanh.f32 %v897_v5 }
 0x133   : > { %v2701_v61 = vpop.eup %2700  ;;  %v1004_v62 = vpack.c.bf16 %v2699_v59, %v2697_v54  ;;  %2726 = vtanh.f32 %v910_v33 }
 0x134   : > { %v1003_v63 = vpack.c.bf16 %v2701_v61, %v2695_v51  ;;  %v2703_v0 = vpop.eup %2702  ;;  %2728 = vtanh.f32 %v913_v44 }
 0x135   : > { %v2705_v2 = vpop.eup %2704 }
 0x136   : > { %2449 = vmatmul.mubr.msk.bf16.gmra.mxu1 %vm1051_vm1, %v999_v38  ;;  %v2707_v4 = vpop.eup %2706 }
 0x137   : > { %2452 = vmatprep.mubr.msk.bf16.mxu1 %vm1051_vm1, %v1000_v50  ;;  %v2709_v8 = vpop.eup %2708  ;;  %v1006_v13 = vpack.c.bf16 %v2707_v4, %v2705_v2 }
 0x138   : > { %v1005_v9 = vpack.c.bf16 %v2709_v8, %v2703_v0  ;;  %v2711_v10 = vpop.eup %2710 }
 0x139   : > { %v2713_v11 = vpop.eup %2712 }
 0x13a   : > { %v2715_v14 = vpop.eup %2714 }
 0x13b   : > { %v2717_v16 = vpop.eup %2716  ;;  %v1008_v19 = vpack.c.bf16 %v2715_v14, %v2713_v11 }
 0x13c   : > { %v1007_v17 = vpack.c.bf16 %v2717_v16, %v2711_v10  ;;  %v2719_v18 = vpop.eup %2718 }
 0x13d   : > { %v2721_v20 = vpop.eup %2720 }
 0x13e   : > { %2453 = vmatmul.mubr.msk.bf16.gmra.mxu1 %vm1051_vm1, %v1001_v47  ;;  %v2723_v21 = vpop.eup %2722 }
 0x13f   : > { %2456 = vmatprep.mubr.msk.bf16.mxu1 %vm1051_vm1, %v1002_v12  ;;  %v2725_v22 = vpop.eup %2724  ;;  %v1010_v31 = vpack.c.bf16 %v2723_v21, %v2721_v20 }
 0x140   : > { %v1009_v23 = vpack.c.bf16 %v2725_v22, %v2719_v18  ;;  %v2727_v39 = vpop.eup %2726 }
 0x141   : > { %v2729_v24 = vpop.eup %2728 }
 0x142   : > { %v1011_v52 = vpack.c.bf16 %v2729_v24, %v2727_v39 }
 0x146   : > { %2457 = vmatmul.mubr.msk.bf16.gmra.mxu1 %vm1051_vm1, %v1003_v63 }
 0x147   : > { %2460 = vmatprep.mubr.msk.bf16.mxu1 %vm1051_vm1, %v1004_v62 }
 0x14e   : > { %2461 = vmatmul.mubr.msk.bf16.gmra.mxu1 %vm1051_vm1, %v1005_v9 }
 0x14f   : > { %2464 = vmatprep.mubr.msk.bf16.mxu1 %vm1051_vm1, %v1006_v13 }
 0x156   : > { %2465 = vmatmul.mubr.msk.bf16.gmra.mxu1 %vm1051_vm1, %v1007_v17 }
 0x157   : > { %2468 = vmatprep.mubr.msk.bf16.mxu1 %vm1051_vm1, %v1008_v19 }
 0x15e   : > { %2469 = vmatmul.mubr.msk.bf16.gmra.mxu1 %vm1051_vm1, %v1009_v23 }
 0x15f   : > { %2472 = vmatprep.mubr.msk.bf16.mxu1 %vm1051_vm1, %v1010_v31 }
 0x166   : > { %2473 = vmatmul.mubr.msk.bf16.gmra.mxu1 %vm1051_vm1, %v1011_v52 }
 0x1ae   : > { %v2414_v26 = vpop.f32.mrf.mxu1 }
 0x1af   : > { %v1191_v32 = vadd.f32 %v2414_v26, %v3189_v28 }
 0x1b0   : > { %v1182_v7 = vpop.f32.mrf.mxu1 }
 0x1b1   : > { %v1183_v37 = vadd.f32 %v3189_v28, %v1182_v7 }
 0x1b2   : > { %v2415_v29 = vpop.f32.mrf.mxu1 }
 0x1b3   : > { %v1194_v30 = vadd.f32 %v2415_v29, %v3189_v28  ;;  %2730 = vtanh.f32 %v1183_v37 }
 0x1b4   : > { %v1185_v34 = vpop.f32.mrf.mxu1 }
 0x1b5   : > { %v1186_v35 = vadd.f32 %v3189_v28, %v1185_v34  ;;  %2732 = vtanh.f32 %v1194_v30 }
 0x1b6   : > { %v2418_v50 = vpop.f32.mrf.mxu1 }
 0x1b7   : > { %2734 = vtanh.f32 %v1186_v35  ;;  %v1207_v58 = vadd.f32 %v2418_v50, %v3189_v28 }
 0x1b8   : > { %2736 = vtanh.f32 %v1191_v32  ;;  %v1198_v38 = vpop.f32.mrf.mxu1 }
 0x1b9   : > { %v1199_v40 = vadd.f32 %v3189_v28, %v1198_v38 }
 0x1ba   : > { %v2419_v27 = vpop.f32.mrf.mxu1 }
 0x1bb   : > { %v1210_v41 = vadd.f32 %v2419_v27, %v3189_v28  ;;  %2738 = vtanh.f32 %v1199_v40 }
 0x1bc   : > { %v1201_v42 = vpop.f32.mrf.mxu1 }
 0x1bd   : > { %v1202_v57 = vadd.f32 %v3189_v28, %v1201_v42  ;;  %2740 = vtanh.f32 %v1210_v41 }
 0x1be   : > { %v2422_v43 = vpop.f32.mrf.mxu1 }
 0x1bf   : > { %2742 = vtanh.f32 %v1202_v57  ;;  %v1223_v51 = vadd.f32 %v2422_v43, %v3189_v28 }
 0x1c0   : > { %2744 = vtanh.f32 %v1207_v58  ;;  %v1214_v45 = vpop.f32.mrf.mxu1  ;;  %v2731_v46 = vpop.eup %2730 }
 0x1c1   : > { %v1215_v6 = vadd.f32 %v3189_v28, %v1214_v45 }
 0x1c2   : > { %v2423_v12 = vpop.f32.mrf.mxu1  ;;  %v2733_v47 = vpop.eup %2732 }
 0x1c3   : > { %v1226_v48 = vadd.f32 %v2423_v12, %v3189_v28  ;;  %2746 = vtanh.f32 %v1215_v6 }
 0x1c4   : > { %v2735_v49 = vpop.eup %2734  ;;  %v1217_v53 = vpop.f32.mrf.mxu1 }
 0x1c5   : > { %v2737_v54 = vpop.eup %2736  ;;  %v1218_v36 = vadd.f32 %v3189_v28, %v1217_v53  ;;  %v1501_v59 = vpack.c.bf16 %v2735_v49, %v2731_v46  ;;  %2748 = vtanh.f32 %v1226_v48 }
 0x1c6   : > { %v1502_v56 = vpack.c.bf16 %v2733_v47, %v2737_v54  ;;  %v2426_v60 = vpop.f32.mrf.mxu1 }
 0x1c7   : > { %2750 = vtanh.f32 %v1218_v36  ;;  %2484 = vmatprep.mubr.msk.bf16.mxu0 %vm1051_vm1, %v1501_v59  ;;  %v1239_v1 = vadd.f32 %v2426_v60, %v3189_v28 }
 0x1c8   : > { %2752 = vtanh.f32 %v1223_v51  ;;  %v1230_v61 = vpop.f32.mrf.mxu1  ;;  %2485 = vmatmul.mubr.msk.bf16.vlgmr.msra.gmra.mxu0 %vm1051_vm1, %v1502_v56  ;;  %v2739_v62 = vpop.eup %2738 }
 0x1c9   : > { %v1231_v55 = vadd.f32 %v3189_v28, %v1230_v61 }
 0x1ca   : > { %v2427_v63 = vpop.f32.mrf.mxu1  ;;  %v2741_v15 = vpop.eup %2740 }
 0x1cb   : > { %v1242_v25 = vadd.f32 %v2427_v63, %v3189_v28  ;;  %2754 = vtanh.f32 %v1231_v55 }
 0x1cc   : > { %v2743_v0 = vpop.eup %2742  ;;  %v1233_v2 = vpop.f32.mrf.mxu1 }
 0x1cd   : > { %v2745_v3 = vpop.eup %2744  ;;  %v1234_v4 = vadd.f32 %v3189_v28, %v1233_v2  ;;  %v1503_v5 = vpack.c.bf16 %v2743_v0, %v2739_v62  ;;  %2756 = vtanh.f32 %v1242_v25 }
 0x1ce   : > { %v2430_v8 = vpop.f32.mrf.mxu1  ;;  %v1504_v13 = vpack.c.bf16 %v2741_v15, %v2745_v3 }
 0x1cf   : > { %2758 = vtanh.f32 %v1234_v4  ;;  %2488 = vmatprep.mubr.msk.bf16.mxu0 %vm1051_vm1, %v1503_v5  ;;  %v1255_v19 = vadd.f32 %v2430_v8, %v3189_v28 }
 0x1d0   : > { %2760 = vtanh.f32 %v1239_v1  ;;  %v1246_v9 = vpop.f32.mrf.mxu1  ;;  %2489 = vmatmul.mubr.msk.bf16.gmra.mxu0 %vm1051_vm1, %v1504_v13  ;;  %v2747_v11 = vpop.eup %2746 }
 0x1d1   : > { %v1247_v10 = vadd.f32 %v3189_v28, %v1246_v9 }
 0x1d2   : > { %v2431_v33 = vpop.f32.mrf.mxu1  ;;  %v2749_v14 = vpop.eup %2748 }
 0x1d3   : > { %v1258_v44 = vadd.f32 %v2431_v33, %v3189_v28  ;;  %2762 = vtanh.f32 %v1247_v10 }
 0x1d4   : > { %v2751_v16 = vpop.eup %2750  ;;  %v1249_v17 = vpop.f32.mrf.mxu1 }
 0x1d5   : > { %v2753_v18 = vpop.eup %2752  ;;  %v1250_v20 = vadd.f32 %v3189_v28, %v1249_v17  ;;  %v1505_v21 = vpack.c.bf16 %v2751_v16, %v2747_v11  ;;  %2764 = vtanh.f32 %v1258_v44 }
 0x1d6   : > { %v2434_v22 = vpop.f32.mrf.mxu1  ;;  %v1506_v31 = vpack.c.bf16 %v2749_v14, %v2753_v18 }
 0x1d7   : > { %2766 = vtanh.f32 %v1250_v20  ;;  %2492 = vmatprep.mubr.msk.bf16.mxu0 %vm1051_vm1, %v1505_v21  ;;  %v1271_v29 = vadd.f32 %v2434_v22, %v3189_v28 }
 0x1d8   : > { %2768 = vtanh.f32 %v1255_v19  ;;  %v1262_v23 = vpop.f32.mrf.mxu1  ;;  %2493 = vmatmul.mubr.msk.bf16.gmra.mxu0 %vm1051_vm1, %v1506_v31  ;;  %v2755_v24 = vpop.eup %2754 }
 0x1d9   : > { %v1263_v39 = vadd.f32 %v3189_v28, %v1262_v23 }
 0x1da   : > { %v2435_v52 = vpop.f32.mrf.mxu1  ;;  %v2757_v26 = vpop.eup %2756 }
 0x1db   : > { %v1274_v7 = vadd.f32 %v2435_v52, %v3189_v28  ;;  %2770 = vtanh.f32 %v1263_v39 }
 0x1dc   : > { %v2759_v37 = vpop.eup %2758  ;;  %v1265_v30 = vpop.f32.mrf.mxu1 }
 0x1dd   : > { %v2761_v32 = vpop.eup %2760  ;;  %v1266_v34 = vadd.f32 %v3189_v28, %v1265_v30  ;;  %v1507_v35 = vpack.c.bf16 %v2759_v37, %v2755_v24  ;;  %2772 = vtanh.f32 %v1274_v7 }
 0x1de   : > { %v2438_v50 = vpop.f32.mrf.mxu1  ;;  %v1508_v38 = vpack.c.bf16 %v2757_v26, %v2761_v32 }
 0x1df   : > { %2774 = vtanh.f32 %v1266_v34  ;;  %2496 = vmatprep.mubr.msk.bf16.mxu0 %vm1051_vm1, %v1507_v35  ;;  %v1287_v45 = vadd.f32 %v2438_v50, %v3189_v28 }
 0x1e0   : > { %2776 = vtanh.f32 %v1271_v29  ;;  %v1278_v40 = vpop.f32.mrf.mxu1  ;;  %2497 = vmatmul.mubr.msk.bf16.gmra.mxu0 %vm1051_vm1, %v1508_v38  ;;  %v2763_v41 = vpop.eup %2762 }
 0x1e1   : > { %v1279_v27 = vadd.f32 %v3189_v28, %v1278_v40 }
 0x1e2   : > { %v2439_v58 = vpop.f32.mrf.mxu1  ;;  %v2765_v42 = vpop.eup %2764 }
 0x1e3   : > { %v1290_v57 = vadd.f32 %v2439_v58, %v3189_v28  ;;  %2778 = vtanh.f32 %v1279_v27 }
 0x1e4   : > { %v2767_v43 = vpop.eup %2766  ;;  %v1281_v6 = vpop.f32.mrf.mxu1 }
 0x1e5   : > { %v2769_v46 = vpop.eup %2768  ;;  %v1282_v12 = vadd.f32 %v3189_v28, %v1281_v6  ;;  %v1509_v47 = vpack.c.bf16 %v2767_v43, %v2763_v41  ;;  %2780 = vtanh.f32 %v1290_v57 }
 0x1e6   : > { %v2442_v48 = vpop.f32.mrf.mxu1  ;;  %v1510_v49 = vpack.c.bf16 %v2765_v42, %v2769_v46 }
 0x1e7   : > { %2782 = vtanh.f32 %v1282_v12  ;;  %2500 = vmatprep.mubr.msk.bf16.mxu0 %vm1051_vm1, %v1509_v47  ;;  %v1303_v61 = vadd.f32 %v2442_v48, %v3189_v28 }
 0x1e8   : > { %2784 = vtanh.f32 %v1287_v45  ;;  %v1294_v51 = vpop.f32.mrf.mxu1  ;;  %2501 = vmatmul.mubr.msk.bf16.gmra.mxu0 %vm1051_vm1, %v1510_v49  ;;  %v2771_v54 = vpop.eup %2770 }
 0x1e9   : > { %v1295_v53 = vadd.f32 %v3189_v28, %v1294_v51 }
 0x1ea   : > { %v2443_v36 = vpop.f32.mrf.mxu1  ;;  %v2773_v59 = vpop.eup %2772 }
 0x1eb   : > { %v1306_v56 = vadd.f32 %v2443_v36, %v3189_v28  ;;  %2786 = vtanh.f32 %v1295_v53 }
 0x1ec   : > { %v2775_v60 = vpop.eup %2774  ;;  %v1297_v55 = vpop.f32.mrf.mxu1 }
 0x1ed   : > { %v2777_v62 = vpop.eup %2776  ;;  %v1298_v63 = vadd.f32 %v3189_v28, %v1297_v55  ;;  %v1511_v15 = vpack.c.bf16 %v2775_v60, %v2771_v54  ;;  %2788 = vtanh.f32 %v1306_v56 }
 0x1ee   : > { %v2446_v25 = vpop.f32.mrf.mxu1  ;;  %v1512_v0 = vpack.c.bf16 %v2773_v59, %v2777_v62 }
 0x1ef   : > { %2790 = vtanh.f32 %v1298_v63  ;;  %2504 = vmatprep.mubr.msk.bf16.mxu0 %vm1051_vm1, %v1511_v15  ;;  %v1319_v9 = vadd.f32 %v2446_v25, %v3189_v28 }
 0x1f0   : > { %2792 = vtanh.f32 %v1303_v61  ;;  %v1310_v1 = vpop.f32.mrf.mxu1  ;;  %2505 = vmatmul.mubr.msk.bf16.gmra.mxu0 %vm1051_vm1, %v1512_v0  ;;  %v2779_v3 = vpop.eup %2778 }
 0x1f1   : > { %v1311_v2 = vadd.f32 %v3189_v28, %v1310_v1 }
 0x1f2   : > { %v2447_v4 = vpop.f32.mrf.mxu1  ;;  %v2781_v5 = vpop.eup %2780 }
 0x1f3   : > { %v1322_v8 = vadd.f32 %v2447_v4, %v3189_v28  ;;  %2794 = vtanh.f32 %v1311_v2 }
 0x1f4   : > { %v2783_v13 = vpop.eup %2782  ;;  %v1313_v10 = vpop.f32.mrf.mxu1 }
 0x1f5   : > { %v2785_v11 = vpop.eup %2784  ;;  %v1314_v33 = vadd.f32 %v3189_v28, %v1313_v10  ;;  %v1513_v14 = vpack.c.bf16 %v2783_v13, %v2779_v3  ;;  %2796 = vtanh.f32 %v1322_v8 }
 0x1f6   : > { %v2450_v44 = vpop.f32.mrf.mxu1  ;;  %v1514_v16 = vpack.c.bf16 %v2781_v5, %v2785_v11 }
 0x1f7   : > { %2798 = vtanh.f32 %v1314_v33  ;;  %2508 = vmatprep.mubr.msk.bf16.mxu0 %vm1051_vm1, %v1513_v14  ;;  %v1335_v23 = vadd.f32 %v2450_v44, %v3189_v28 }
 0x1f8   : > { %2800 = vtanh.f32 %v1319_v9  ;;  %v1326_v19 = vpop.f32.mrf.mxu1  ;;  %2509 = vmatmul.mubr.msk.bf16.gmra.mxu0 %vm1051_vm1, %v1514_v16  ;;  %v2787_v18 = vpop.eup %2786 }
 0x1f9   : > { %v1327_v17 = vadd.f32 %v3189_v28, %v1326_v19 }
 0x1fa   : > { %v2451_v20 = vpop.f32.mrf.mxu1  ;;  %v2789_v21 = vpop.eup %2788 }
 0x1fb   : > { %v1338_v22 = vadd.f32 %v2451_v20, %v3189_v28  ;;  %2802 = vtanh.f32 %v1327_v17 }
 0x1fc   : > { %v2791_v31 = vpop.eup %2790  ;;  %v1329_v39 = vpop.f32.mrf.mxu1 }
 0x1fd   : > { %v2793_v24 = vpop.eup %2792  ;;  %v1330_v52 = vadd.f32 %v3189_v28, %v1329_v39  ;;  %v1515_v26 = vpack.c.bf16 %v2791_v31, %v2787_v18  ;;  %2804 = vtanh.f32 %v1338_v22 }
 0x1fe   : > { %v2454_v7 = vpop.f32.mrf.mxu1  ;;  %v1516_v37 = vpack.c.bf16 %v2789_v21, %v2793_v24 }
 0x1ff   : > { %2806 = vtanh.f32 %v1330_v52  ;;  %2512 = vmatprep.mubr.msk.bf16.mxu0 %vm1051_vm1, %v1515_v26  ;;  %v1351_v40 = vadd.f32 %v2454_v7, %v3189_v28 }
 0x200   : > { %2808 = vtanh.f32 %v1335_v23  ;;  %v1342_v29 = vpop.f32.mrf.mxu1  ;;  %2513 = vmatmul.mubr.msk.bf16.gmra.mxu0 %vm1051_vm1, %v1516_v37  ;;  %v2795_v32 = vpop.eup %2794 }
 0x201   : > { %v1343_v30 = vadd.f32 %v3189_v28, %v1342_v29 }
 0x202   : > { %v2455_v34 = vpop.f32.mrf.mxu1  ;;  %v2797_v35 = vpop.eup %2796 }
 0x203   : > { %v1354_v50 = vadd.f32 %v2455_v34, %v3189_v28  ;;  %2810 = vtanh.f32 %v1343_v30 }
 0x204   : > { %v2799_v38 = vpop.eup %2798  ;;  %v1345_v27 = vpop.f32.mrf.mxu1 }
 0x205   : > { %v2801_v41 = vpop.eup %2800  ;;  %v1346_v58 = vadd.f32 %v3189_v28, %v1345_v27  ;;  %v1517_v42 = vpack.c.bf16 %v2799_v38, %v2795_v32  ;;  %2812 = vtanh.f32 %v1354_v50 }
 0x206   : > { %v2458_v57 = vpop.f32.mrf.mxu1  ;;  %v1518_v43 = vpack.c.bf16 %v2797_v35, %v2801_v41 }
 0x207   : > { %2814 = vtanh.f32 %v1346_v58  ;;  %2516 = vmatprep.mubr.msk.bf16.mxu0 %vm1051_vm1, %v1517_v42  ;;  %v1367_v51 = vadd.f32 %v2458_v57, %v3189_v28 }
 0x208   : > { %2816 = vtanh.f32 %v1351_v40  ;;  %v1358_v45 = vpop.f32.mrf.mxu1  ;;  %2517 = vmatmul.mubr.msk.bf16.gmra.mxu0 %vm1051_vm1, %v1518_v43  ;;  %v2803_v46 = vpop.eup %2802 }
 0x209   : > { %v1359_v6 = vadd.f32 %v3189_v28, %v1358_v45 }
 0x20a   : > { %v2459_v12 = vpop.f32.mrf.mxu1  ;;  %v2805_v47 = vpop.eup %2804 }
 0x20b   : > { %v1370_v48 = vadd.f32 %v2459_v12, %v3189_v28  ;;  %2818 = vtanh.f32 %v1359_v6 }
 0x20c   : > { %v2807_v49 = vpop.eup %2806  ;;  %v1361_v53 = vpop.f32.mrf.mxu1 }
 0x20d   : > { %v2809_v54 = vpop.eup %2808  ;;  %v1362_v36 = vadd.f32 %v3189_v28, %v1361_v53  ;;  %v1519_v59 = vpack.c.bf16 %v2807_v49, %v2803_v46  ;;  %2820 = vtanh.f32 %v1370_v48 }
 0x20e   : > { %v2462_v56 = vpop.f32.mrf.mxu1  ;;  %v1520_v60 = vpack.c.bf16 %v2805_v47, %v2809_v54 }
 0x20f   : > { %2822 = vtanh.f32 %v1362_v36  ;;  %2520 = vmatprep.mubr.msk.bf16.mxu0 %vm1051_vm1, %v1519_v59  ;;  %v1383_v1 = vadd.f32 %v2462_v56, %v3189_v28 }
 0x210   : > { %2824 = vtanh.f32 %v1367_v51  ;;  %v1374_v61 = vpop.f32.mrf.mxu1  ;;  %2521 = vmatmul.mubr.msk.bf16.gmra.mxu0 %vm1051_vm1, %v1520_v60  ;;  %v2811_v62 = vpop.eup %2810 }
 0x211   : > { %v1375_v55 = vadd.f32 %v3189_v28, %v1374_v61 }
 0x212   : > { %v2463_v63 = vpop.f32.mrf.mxu1  ;;  %v2813_v15 = vpop.eup %2812 }
 0x213   : > { %v1386_v25 = vadd.f32 %v2463_v63, %v3189_v28  ;;  %2826 = vtanh.f32 %v1375_v55  ;;  %v3291_v63 = vld [vmem:[%s3499_s6] ss:$0 sm:$0xff] }
 0x214   : > { %v2815_v0 = vpop.eup %2814  ;;  %v1377_v2 = vpop.f32.mrf.mxu1 }
 0x215   : > { %v2817_v3 = vpop.eup %2816  ;;  %v1378_v4 = vadd.f32 %v3189_v28, %v1377_v2  ;;  %v1521_v5 = vpack.c.bf16 %v2815_v0, %v2811_v62  ;;  %2828 = vtanh.f32 %v1386_v25 }
 0x216   : > { %v2466_v8 = vpop.f32.mrf.mxu1  ;;  %v1522_v13 = vpack.c.bf16 %v2813_v15, %v2817_v3 }
 0x217   : > { %2830 = vtanh.f32 %v1378_v4  ;;  %2524 = vmatprep.mubr.msk.bf16.mxu0 %vm1051_vm1, %v1521_v5  ;;  %v1399_v19 = vadd.f32 %v2466_v8, %v3189_v28 }
 0x218   : > { %2832 = vtanh.f32 %v1383_v1  ;;  %v1390_v9 = vpop.f32.mrf.mxu1  ;;  %2525 = vmatmul.mubr.msk.bf16.gmra.mxu0 %vm1051_vm1, %v1522_v13  ;;  %v2819_v11 = vpop.eup %2818 }
 0x219   : > { %v1391_v10 = vadd.f32 %v3189_v28, %v1390_v9 }
 0x21a   : > { %v2467_v33 = vpop.f32.mrf.mxu1  ;;  %v2821_v14 = vpop.eup %2820 }
 0x21b   : > { %v1402_v44 = vadd.f32 %v2467_v33, %v3189_v28  ;;  %2834 = vtanh.f32 %v1391_v10 }
 0x21c   : > { %v2823_v16 = vpop.eup %2822  ;;  %v1393_v17 = vpop.f32.mrf.mxu1 }
 0x21d   : > { %v2825_v18 = vpop.eup %2824  ;;  %v1394_v20 = vadd.f32 %v3189_v28, %v1393_v17  ;;  %v1523_v21 = vpack.c.bf16 %v2823_v16, %v2819_v11  ;;  %2836 = vtanh.f32 %v1402_v44 }
 0x21e   : > { %v2470_v22 = vpop.f32.mrf.mxu1  ;;  %v1524_v31 = vpack.c.bf16 %v2821_v14, %v2825_v18 }
 0x21f   : > { %2838 = vtanh.f32 %v1394_v20  ;;  %2528 = vmatprep.mubr.msk.bf16.mxu0 %vm1051_vm1, %v1523_v21  ;;  %v1415_v29 = vadd.f32 %v2470_v22, %v3189_v28 }
 0x220   : > { %2840 = vtanh.f32 %v1399_v19  ;;  %v1406_v23 = vpop.f32.mrf.mxu1  ;;  %2529 = vmatmul.mubr.msk.bf16.gmra.mxu0 %vm1051_vm1, %v1524_v31  ;;  %v2827_v24 = vpop.eup %2826 }
 0x221   : > { %v1407_v39 = vadd.f32 %v3189_v28, %v1406_v23 }
 0x222   : > { %v2471_v52 = vpop.f32.mrf.mxu1  ;;  %v2829_v26 = vpop.eup %2828 }
 0x223   : > { %v1418_v7 = vadd.f32 %v2471_v52, %v3189_v28  ;;  %2842 = vtanh.f32 %v1407_v39 }
 0x224   : > { %v2831_v37 = vpop.eup %2830  ;;  %v1409_v30 = vpop.f32.mrf.mxu1 }
 0x225   : > { %v2833_v32 = vpop.eup %2832  ;;  %v1410_v34 = vadd.f32 %v3189_v28, %v1409_v30  ;;  %v1525_v35 = vpack.c.bf16 %v2831_v37, %v2827_v24  ;;  %2844 = vtanh.f32 %v1418_v7 }
 0x226   : > { %v2474_v50 = vpop.f32.mrf.mxu1  ;;  %v1526_v38 = vpack.c.bf16 %v2829_v26, %v2833_v32 }
 0x227   : > { %2846 = vtanh.f32 %v1410_v34  ;;  %2532 = vmatprep.mubr.msk.bf16.mxu0 %vm1051_vm1, %v1525_v35  ;;  %v1431_v45 = vadd.f32 %v2474_v50, %v3189_v28 }
 0x228   : > { %2848 = vtanh.f32 %v1415_v29  ;;  %v1422_v40 = vpop.f32.mrf.mxu1  ;;  %2533 = vmatmul.mubr.msk.bf16.gmra.mxu0 %vm1051_vm1, %v1526_v38  ;;  %v2835_v41 = vpop.eup %2834 }
 0x229   : > { %v1423_v27 = vadd.f32 %v3189_v28, %v1422_v40 }
 0x22a   : > { %v2475_v58 = vpop.f32.mrf.mxu1  ;;  %v2837_v42 = vpop.eup %2836 }
 0x22b   : > { %v1434_v57 = vadd.f32 %v2475_v58, %v3189_v28  ;;  %2850 = vtanh.f32 %v1423_v27 }
 0x22c   : > { %v2839_v43 = vpop.eup %2838  ;;  %v1425_v6 = vpop.f32.mrf.mxu1 }
 0x22d   : > { %v2841_v46 = vpop.eup %2840  ;;  %v1426_v12 = vadd.f32 %v3189_v28, %v1425_v6  ;;  %v1527_v47 = vpack.c.bf16 %v2839_v43, %v2835_v41  ;;  %2852 = vtanh.f32 %v1434_v57 }
 0x22e   : > { %v1528_v48 = vpack.c.bf16 %v2837_v42, %v2841_v46 }
 0x22f   : > { %2854 = vtanh.f32 %v1426_v12  ;;  %2536 = vmatprep.mubr.msk.bf16.mxu0 %vm1051_vm1, %v1527_v47 }
 0x230   : > { %2856 = vtanh.f32 %v1431_v45  ;;  %2537 = vmatmul.mubr.msk.bf16.gmra.mxu0 %vm1051_vm1, %v1528_v48  ;;  %v2843_v49 = vpop.eup %2842 }
 0x232   : > { %v2845_v51 = vpop.eup %2844 }
 0x234   : > { %v2847_v53 = vpop.eup %2846 }
 0x235   : > { %v2849_v54 = vpop.eup %2848  ;;  %v1529_v36 = vpack.c.bf16 %v2847_v53, %v2843_v49 }
 0x236   : > { %v1530_v59 = vpack.c.bf16 %v2845_v51, %v2849_v54 }
 0x237   : > { %2540 = vmatprep.mubr.msk.bf16.mxu0 %vm1051_vm1, %v1529_v36 }
 0x238   : > { %2541 = vmatmul.mubr.msk.bf16.gmra.mxu0 %vm1051_vm1, %v1530_v59  ;;  %v2851_v28 = vpop.eup %2850 }
 0x23a   : > { %v2853_v56 = vpop.eup %2852 }
 0x23c   : > { %v2855_v60 = vpop.eup %2854 }
 0x23d   : > { %v2857_v61 = vpop.eup %2856  ;;  %v1531_v55 = vpack.c.bf16 %v2855_v60, %v2851_v28 }
 0x23e   : > { %v1532_v62 = vpack.c.bf16 %v2853_v56, %v2857_v61 }
 0x23f   : > { %2544 = vmatprep.mubr.msk.bf16.mxu0 %vm1051_vm1, %v1531_v55 }
 0x240   : > { %2545 = vmatmul.mubr.msk.bf16.gmra.mxu0 %vm1051_vm1, %v1532_v62 }
 0x288   : > { %v2486_v15 = vpop.f32.mrf.mxu0 }
 0x289   : > { %v1711_v25 = vadd.f32 %v2486_v15, %v3291_v63 }
 0x28a   : > { %v1702_v0 = vpop.f32.mrf.mxu0 }
 0x28b   : > { %1960 = vst.msk [vmem:[%s3296_s16 + $0x10] sm:$0xff] %vm1957_vm2, %v1711_v25  ;;  %v1703_v1 = vadd.f32 %v3291_v63, %v1702_v0 }
 0x28c   : > { %v2487_v2 = vpop.f32.mrf.mxu0 }
 0x28d   : > { %1958 = vst.msk [vmem:[%s3296_s16] sm:$0xff] %vm1957_vm2, %v1703_v1  ;;  %v1714_v3 = vadd.f32 %v2487_v2, %v3291_v63 }
 0x28e   : > { %v1705_v4 = vpop.f32.mrf.mxu0 }
 0x28f   : > { %1961 = vst.msk [vmem:[%s3296_s16 + $0x18] sm:$0xff] %vm1957_vm2, %v1714_v3  ;;  %v1706_v5 = vadd.f32 %v3291_v63, %v1705_v4 }
 0x290   : > { %v2490_v8 = vpop.f32.mrf.mxu0 }
 0x291   : > { %1959 = vst.msk [vmem:[%s3296_s16 + $0x8] sm:$0xff] %vm1957_vm2, %v1706_v5  ;;  %v1727_v13 = vadd.f32 %v2490_v8, %v3291_v63 }
 0x292   : > { %v1718_v9 = vpop.f32.mrf.mxu0 }
 0x293   : > { %1964 = vst.msk [vmem:[%s3296_s16 + $0x30] sm:$0xff] %vm1957_vm2, %v1727_v13  ;;  %v1719_v10 = vadd.f32 %v3291_v63, %v1718_v9 }
 0x294   : > { %v2491_v11 = vpop.f32.mrf.mxu0 }
 0x295   : > { %1962 = vst.msk [vmem:[%s3296_s16 + $0x20] sm:$0xff] %vm1957_vm2, %v1719_v10  ;;  %v1730_v33 = vadd.f32 %v2491_v11, %v3291_v63 }
 0x296   : > { %v1721_v14 = vpop.f32.mrf.mxu0 }
 0x297   : > { %1965 = vst.msk [vmem:[%s3296_s16 + $0x38] sm:$0xff] %vm1957_vm2, %v1730_v33  ;;  %v1722_v44 = vadd.f32 %v3291_v63, %v1721_v14 }
 0x298   : > { %v2494_v16 = vpop.f32.mrf.mxu0 }
 0x299   : > { %1963 = vst.msk [vmem:[%s3296_s16 + $0x28] sm:$0xff] %vm1957_vm2, %v1722_v44  ;;  %v1743_v19 = vadd.f32 %v2494_v16, %v3291_v63 }
 0x29a   : > { %v1734_v17 = vpop.f32.mrf.mxu0 }
 0x29b   : > { %1968 = vst.msk [vmem:[%s3296_s16 + $0x50] sm:$0xff] %vm1957_vm2, %v1743_v19  ;;  %v1735_v18 = vadd.f32 %v3291_v63, %v1734_v17 }
 0x29c   : > { %v2495_v20 = vpop.f32.mrf.mxu0 }
 0x29d   : > { %1966 = vst.msk [vmem:[%s3296_s16 + $0x40] sm:$0xff] %vm1957_vm2, %v1735_v18  ;;  %v1746_v21 = vadd.f32 %v2495_v20, %v3291_v63 }
 0x29e   : > { %v1737_v22 = vpop.f32.mrf.mxu0 }
 0x29f   : > { %1969 = vst.msk [vmem:[%s3296_s16 + $0x58] sm:$0xff] %vm1957_vm2, %v1746_v21  ;;  %v1738_v31 = vadd.f32 %v3291_v63, %v1737_v22 }
 0x2a0   : > { %v2498_v23 = vpop.f32.mrf.mxu0 }
 0x2a1   : > { %1967 = vst.msk [vmem:[%s3296_s16 + $0x48] sm:$0xff] %vm1957_vm2, %v1738_v31  ;;  %v1759_v39 = vadd.f32 %v2498_v23, %v3291_v63 }
 0x2a2   : > { %v1750_v24 = vpop.f32.mrf.mxu0 }
 0x2a3   : > { %1972 = vst.msk [vmem:[%s3296_s16 + $0x70] sm:$0xff] %vm1957_vm2, %v1759_v39  ;;  %v1751_v52 = vadd.f32 %v3291_v63, %v1750_v24 }
 0x2a4   : > { %v2499_v26 = vpop.f32.mrf.mxu0 }
 0x2a5   : > { %1970 = vst.msk [vmem:[%s3296_s16 + $0x60] sm:$0xff] %vm1957_vm2, %v1751_v52  ;;  %v1762_v7 = vadd.f32 %v2499_v26, %v3291_v63 }
 0x2a6   : > { %v1753_v37 = vpop.f32.mrf.mxu0 }
 0x2a7   : > { %1973 = vst.msk [vmem:[%s3296_s16 + $0x78] sm:$0xff] %vm1957_vm2, %v1762_v7  ;;  %v1754_v29 = vadd.f32 %v3291_v63, %v1753_v37 }
 0x2a8   : > { %v2502_v30 = vpop.f32.mrf.mxu0 }
 0x2a9   : > { %1971 = vst.msk [vmem:[%s3296_s16 + $0x68] sm:$0xff] %vm1957_vm2, %v1754_v29  ;;  %v1775_v32 = vadd.f32 %v2502_v30, %v3291_v63 }
 0x2aa   : > { %v1766_v34 = vpop.f32.mrf.mxu0 }
 0x2ab   : > { %1976 = vst.msk [vmem:[%s3296_s16 + $0x90] sm:$0xff] %vm1957_vm2, %v1775_v32  ;;  %v1767_v35 = vadd.f32 %v3291_v63, %v1766_v34 }
 0x2ac   : > { %v2503_v50 = vpop.f32.mrf.mxu0 }
 0x2ad   : > { %1974 = vst.msk [vmem:[%s3296_s16 + $0x80] sm:$0xff] %vm1957_vm2, %v1767_v35  ;;  %v1778_v38 = vadd.f32 %v2503_v50, %v3291_v63 }
 0x2ae   : > { %v1769_v40 = vpop.f32.mrf.mxu0 }
 0x2af   : > { %1977 = vst.msk [vmem:[%s3296_s16 + $0x98] sm:$0xff] %vm1957_vm2, %v1778_v38  ;;  %v1770_v27 = vadd.f32 %v3291_v63, %v1769_v40 }
 0x2b0   : > { %v2506_v41 = vpop.f32.mrf.mxu0 }
 0x2b1   : > { %1975 = vst.msk [vmem:[%s3296_s16 + $0x88] sm:$0xff] %vm1957_vm2, %v1770_v27  ;;  %v1791_v58 = vadd.f32 %v2506_v41, %v3291_v63 }
 0x2b2   : > { %v1782_v42 = vpop.f32.mrf.mxu0 }
 0x2b3   : > { %1980 = vst.msk [vmem:[%s3296_s16 + $0xb0] sm:$0xff] %vm1957_vm2, %v1791_v58  ;;  %v1783_v57 = vadd.f32 %v3291_v63, %v1782_v42 }
 0x2b4   : > { %v2507_v43 = vpop.f32.mrf.mxu0 }
 0x2b5   : > { %1978 = vst.msk [vmem:[%s3296_s16 + $0xa0] sm:$0xff] %vm1957_vm2, %v1783_v57  ;;  %v1794_v45 = vadd.f32 %v2507_v43, %v3291_v63 }
 0x2b6   : > { %v1785_v6 = vpop.f32.mrf.mxu0 }
 0x2b7   : > { %1981 = vst.msk [vmem:[%s3296_s16 + $0xb8] sm:$0xff] %vm1957_vm2, %v1794_v45  ;;  %v1786_v46 = vadd.f32 %v3291_v63, %v1785_v6 }
 0x2b8   : > { %v2510_v12 = vpop.f32.mrf.mxu0 }
 0x2b9   : > { %1979 = vst.msk [vmem:[%s3296_s16 + $0xa8] sm:$0xff] %vm1957_vm2, %v1786_v46  ;;  %v1807_v47 = vadd.f32 %v2510_v12, %v3291_v63 }
 0x2ba   : > { %v1798_v48 = vpop.f32.mrf.mxu0 }
 0x2bb   : > { %1984 = vst.msk [vmem:[%s3296_s16 + $0xd0] sm:$0xff] %vm1957_vm2, %v1807_v47  ;;  %v1799_v49 = vadd.f32 %v3291_v63, %v1798_v48 }
 0x2bc   : > { %v2511_v51 = vpop.f32.mrf.mxu0 }
 0x2bd   : > { %1982 = vst.msk [vmem:[%s3296_s16 + $0xc0] sm:$0xff] %vm1957_vm2, %v1799_v49  ;;  %v1810_v53 = vadd.f32 %v2511_v51, %v3291_v63 }
 0x2be   : > { %v1801_v54 = vpop.f32.mrf.mxu0 }
 0x2bf   : > { %1985 = vst.msk [vmem:[%s3296_s16 + $0xd8] sm:$0xff] %vm1957_vm2, %v1810_v53  ;;  %v1802_v36 = vadd.f32 %v3291_v63, %v1801_v54 }
 0x2c0   : > { %v2514_v59 = vpop.f32.mrf.mxu0 }
 0x2c1   : > { %1983 = vst.msk [vmem:[%s3296_s16 + $0xc8] sm:$0xff] %vm1957_vm2, %v1802_v36  ;;  %v1823_v28 = vadd.f32 %v2514_v59, %v3291_v63 }
 0x2c2   : > { %v1814_v56 = vpop.f32.mrf.mxu0 }
 0x2c3   : > { %1988 = vst.msk [vmem:[%s3296_s16 + $0xf0] sm:$0xff] %vm1957_vm2, %v1823_v28  ;;  %v1815_v60 = vadd.f32 %v3291_v63, %v1814_v56 }
 0x2c4   : > { %v2515_v61 = vpop.f32.mrf.mxu0 }
 0x2c5   : > { %1986 = vst.msk [vmem:[%s3296_s16 + $0xe0] sm:$0xff] %vm1957_vm2, %v1815_v60  ;;  %v1826_v55 = vadd.f32 %v2515_v61, %v3291_v63 }
 0x2c6   : > { %v1817_v62 = vpop.f32.mrf.mxu0 }
 0x2c7   : > { %1989 = vst.msk [vmem:[%s3296_s16 + $0xf8] sm:$0xff] %vm1957_vm2, %v1826_v55  ;;  %v1818_v15 = vadd.f32 %v3291_v63, %v1817_v62 }
 0x2c8   : > { %v2518_v25 = vpop.f32.mrf.mxu0 }
 0x2c9   : > { %1987 = vst.msk [vmem:[%s3296_s16 + $0xe8] sm:$0xff] %vm1957_vm2, %v1818_v15  ;;  %v1839_v0 = vadd.f32 %v2518_v25, %v3291_v63 }
 0x2ca   : > { %v1830_v1 = vpop.f32.mrf.mxu0 }
 0x2cb   : > { %1992 = vst.msk [vmem:[%s3296_s16 + $0x110] sm:$0xff] %vm1957_vm2, %v1839_v0  ;;  %v1831_v2 = vadd.f32 %v3291_v63, %v1830_v1 }
 0x2cc   : > { %v2519_v3 = vpop.f32.mrf.mxu0 }
 0x2cd   : > { %1990 = vst.msk [vmem:[%s3296_s16 + $0x100] sm:$0xff] %vm1957_vm2, %v1831_v2  ;;  %v1842_v4 = vadd.f32 %v2519_v3, %v3291_v63 }
 0x2ce   : > { %v1833_v5 = vpop.f32.mrf.mxu0 }
 0x2cf   : > { %1993 = vst.msk [vmem:[%s3296_s16 + $0x118] sm:$0xff] %vm1957_vm2, %v1842_v4  ;;  %v1834_v8 = vadd.f32 %v3291_v63, %v1833_v5 }
 0x2d0   : > { %v2522_v13 = vpop.f32.mrf.mxu0 }
 0x2d1   : > { %1991 = vst.msk [vmem:[%s3296_s16 + $0x108] sm:$0xff] %vm1957_vm2, %v1834_v8  ;;  %v1855_v9 = vadd.f32 %v2522_v13, %v3291_v63 }
 0x2d2   : > { %v1846_v10 = vpop.f32.mrf.mxu0 }
 0x2d3   : > { %1996 = vst.msk [vmem:[%s3296_s16 + $0x130] sm:$0xff] %vm1957_vm2, %v1855_v9  ;;  %v1847_v11 = vadd.f32 %v3291_v63, %v1846_v10 }
 0x2d4   : > { %v2523_v33 = vpop.f32.mrf.mxu0 }
 0x2d5   : > { %1994 = vst.msk [vmem:[%s3296_s16 + $0x120] sm:$0xff] %vm1957_vm2, %v1847_v11  ;;  %v1858_v14 = vadd.f32 %v2523_v33, %v3291_v63 }
 0x2d6   : > { %v1849_v44 = vpop.f32.mrf.mxu0 }
 0x2d7   : > { %1997 = vst.msk [vmem:[%s3296_s16 + $0x138] sm:$0xff] %vm1957_vm2, %v1858_v14  ;;  %v1850_v16 = vadd.f32 %v3291_v63, %v1849_v44 }
 0x2d8   : > { %v2526_v19 = vpop.f32.mrf.mxu0 }
 0x2d9   : > { %1995 = vst.msk [vmem:[%s3296_s16 + $0x128] sm:$0xff] %vm1957_vm2, %v1850_v16  ;;  %v1871_v17 = vadd.f32 %v2526_v19, %v3291_v63 }
 0x2da   : > { %v1862_v18 = vpop.f32.mrf.mxu0 }
 0x2db   : > { %2000 = vst.msk [vmem:[%s3296_s16 + $0x150] sm:$0xff] %vm1957_vm2, %v1871_v17  ;;  %v1863_v20 = vadd.f32 %v3291_v63, %v1862_v18 }
 0x2dc   : > { %v2527_v21 = vpop.f32.mrf.mxu0 }
 0x2dd   : > { %1998 = vst.msk [vmem:[%s3296_s16 + $0x140] sm:$0xff] %vm1957_vm2, %v1863_v20  ;;  %v1874_v22 = vadd.f32 %v2527_v21, %v3291_v63 }
 0x2de   : > { %v1865_v31 = vpop.f32.mrf.mxu0 }
 0x2df   : > { %2001 = vst.msk [vmem:[%s3296_s16 + $0x158] sm:$0xff] %vm1957_vm2, %v1874_v22  ;;  %v1866_v23 = vadd.f32 %v3291_v63, %v1865_v31 }
 0x2e0   : > { %v2530_v39 = vpop.f32.mrf.mxu0 }
 0x2e1   : > { %1999 = vst.msk [vmem:[%s3296_s16 + $0x148] sm:$0xff] %vm1957_vm2, %v1866_v23  ;;  %v1887_v24 = vadd.f32 %v2530_v39, %v3291_v63 }
 0x2e2   : > { %v1878_v52 = vpop.f32.mrf.mxu0 }
 0x2e3   : > { %2004 = vst.msk [vmem:[%s3296_s16 + $0x170] sm:$0xff] %vm1957_vm2, %v1887_v24  ;;  %v1879_v26 = vadd.f32 %v3291_v63, %v1878_v52 }
 0x2e4   : > { %v2531_v7 = vpop.f32.mrf.mxu0 }
 0x2e5   : > { %2002 = vst.msk [vmem:[%s3296_s16 + $0x160] sm:$0xff] %vm1957_vm2, %v1879_v26  ;;  %v1890_v37 = vadd.f32 %v2531_v7, %v3291_v63 }
 0x2e6   : > { %v1881_v29 = vpop.f32.mrf.mxu0 }
 0x2e7   : > { %2005 = vst.msk [vmem:[%s3296_s16 + $0x178] sm:$0xff] %vm1957_vm2, %v1890_v37  ;;  %v1882_v30 = vadd.f32 %v3291_v63, %v1881_v29 }
 0x2e8   : > { %v2534_v32 = vpop.f32.mrf.mxu0 }
 0x2e9   : > { %2003 = vst.msk [vmem:[%s3296_s16 + $0x168] sm:$0xff] %vm1957_vm2, %v1882_v30  ;;  %v1903_v34 = vadd.f32 %v2534_v32, %v3291_v63 }
 0x2ea   : > { %v1894_v35 = vpop.f32.mrf.mxu0 }
 0x2eb   : > { %2008 = vst.msk [vmem:[%s3296_s16 + $0x190] sm:$0xff] %vm1957_vm2, %v1903_v34  ;;  %v1895_v50 = vadd.f32 %v3291_v63, %v1894_v35 }
 0x2ec   : > { %v2535_v38 = vpop.f32.mrf.mxu0 }
 0x2ed   : > { %2006 = vst.msk [vmem:[%s3296_s16 + $0x180] sm:$0xff] %vm1957_vm2, %v1895_v50  ;;  %v1906_v40 = vadd.f32 %v2535_v38, %v3291_v63 }
 0x2ee   : > { %v1897_v27 = vpop.f32.mrf.mxu0 }
 0x2ef   : > { %2009 = vst.msk [vmem:[%s3296_s16 + $0x198] sm:$0xff] %vm1957_vm2, %v1906_v40  ;;  %v1898_v41 = vadd.f32 %v3291_v63, %v1897_v27 }
 0x2f0   : > { %v2538_v58 = vpop.f32.mrf.mxu0 }
 0x2f1   : > { %2007 = vst.msk [vmem:[%s3296_s16 + $0x188] sm:$0xff] %vm1957_vm2, %v1898_v41  ;;  %v1919_v42 = vadd.f32 %v2538_v58, %v3291_v63 }
 0x2f2   : > { %v1910_v57 = vpop.f32.mrf.mxu0 }
 0x2f3   : > { %2012 = vst.msk [vmem:[%s3296_s16 + $0x1b0] sm:$0xff] %vm1957_vm2, %v1919_v42  ;;  %v1911_v43 = vadd.f32 %v3291_v63, %v1910_v57 }
 0x2f4   : > { %v2539_v45 = vpop.f32.mrf.mxu0 }
 0x2f5   : > { %2010 = vst.msk [vmem:[%s3296_s16 + $0x1a0] sm:$0xff] %vm1957_vm2, %v1911_v43  ;;  %v1922_v6 = vadd.f32 %v2539_v45, %v3291_v63 }
 0x2f6   : > { %v1913_v46 = vpop.f32.mrf.mxu0 }
 0x2f7   : > { %2013 = vst.msk [vmem:[%s3296_s16 + $0x1b8] sm:$0xff] %vm1957_vm2, %v1922_v6  ;;  %v1914_v12 = vadd.f32 %v3291_v63, %v1913_v46 }
 0x2f8   : > { %v2542_v47 = vpop.f32.mrf.mxu0 }
 0x2f9   : > { %2011 = vst.msk [vmem:[%s3296_s16 + $0x1a8] sm:$0xff] %vm1957_vm2, %v1914_v12  ;;  %v1935_v48 = vadd.f32 %v2542_v47, %v3291_v63 }
 0x2fa   : > { %v1926_v49 = vpop.f32.mrf.mxu0 }
 0x2fb   : > { %2016 = vst.msk [vmem:[%s3296_s16 + $0x1d0] sm:$0xff] %vm1957_vm2, %v1935_v48  ;;  %v1927_v51 = vadd.f32 %v3291_v63, %v1926_v49 }
 0x2fc   : > { %v2543_v53 = vpop.f32.mrf.mxu0 }
 0x2fd   : > { %2014 = vst.msk [vmem:[%s3296_s16 + $0x1c0] sm:$0xff] %vm1957_vm2, %v1927_v51  ;;  %v1938_v54 = vadd.f32 %v2543_v53, %v3291_v63 }
 0x2fe   : > { %v1929_v36 = vpop.f32.mrf.mxu0 }
 0x2ff   : > { %2017 = vst.msk [vmem:[%s3296_s16 + $0x1d8] sm:$0xff] %vm1957_vm2, %v1938_v54  ;;  %v1930_v59 = vadd.f32 %v3291_v63, %v1929_v36 }
 0x300   : > { %v2546_v28 = vpop.f32.mrf.mxu0 }
 0x301   : > { %2015 = vst.msk [vmem:[%s3296_s16 + $0x1c8] sm:$0xff] %vm1957_vm2, %v1930_v59  ;;  %v1951_v56 = vadd.f32 %v2546_v28, %v3291_v63 }
 0x302   : > { %v1942_v60 = vpop.f32.mrf.mxu0 }
 0x303   : > { %2020 = vst.msk [vmem:[%s3296_s16 + $0x1f0] sm:$0xff] %vm1957_vm2, %v1951_v56  ;;  %v1943_v61 = vadd.f32 %v3291_v63, %v1942_v60 }
 0x304   : > { %v2547_v55 = vpop.f32.mrf.mxu0 }
 0x305   : > { %2018 = vst.msk [vmem:[%s3296_s16 + $0x1e0] sm:$0xff] %vm1957_vm2, %v1943_v61  ;;  %v1954_v62 = vadd.f32 %v2547_v55, %v3291_v63 }
 0x306   : > { %v1945_v15 = vpop.f32.mrf.mxu0 }
 0x307   : > { %2021 = vst.msk [vmem:[%s3296_s16 + $0x1f8] sm:$0xff] %vm1957_vm2, %v1954_v62  ;;  %v1946_v25 = vadd.f32 %v3291_v63, %v1945_v15 }
 0x309   : > { %2019 = vst.msk [vmem:[%s3296_s16 + $0x1e8] sm:$0xff] %vm1957_vm2, %v1946_v25 }
 0x30a PF: > { %s17_s24 = sadd.s32 1, %s2864_s24  }
 0x30b   : > { %p14_p4 = scmp.ge.s32.totalorder %s17_s24, 4  }
 0x30d   :  { %16 = sbr.rel (!%p14_p4) target bundleno = 1 (0x1), region = 78 }

</bundles_post_ra>
